<compile_context>
chip_gen: v5e
topology: v5e:2x2
jax: 0.10.0
libtpu: 0.0.40
codegen_flags: <defaults>
</compile_context>

<pallas_src>
import functools

import jax
import jax.numpy as jnp
from jax.experimental import pallas as pl
from jax.experimental.pallas import tpu as pltpu

BN_EPS = 1e-5
LANE = 128


def _round_up(x, m):
    return ((x + m - 1) // m) * m


# --------------------------------------------------------------------------
# CORE_PARALLEL support probe (cached).  Single-core chips / older stacks
# fall back to ARBITRARY; on v7x this splits the two encoders across the
# two TensorCores.
# --------------------------------------------------------------------------
_CORE_PARALLEL_OK = None


def _core_parallel_supported():
    global _CORE_PARALLEL_OK
    if _CORE_PARALLEL_OK is None:
        try:
            def _probe(x_ref, o_ref):
                o_ref[...] = x_ref[...] + 1.0

            f = pl.pallas_call(
                _probe,
                out_shape=jax.ShapeDtypeStruct((2, 8, 128), jnp.float32),
                grid=(2,),
                in_specs=[pl.BlockSpec((1, 8, 128), lambda e: (e, 0, 0))],
                out_specs=pl.BlockSpec((1, 8, 128), lambda e: (e, 0, 0)),
                compiler_params=pltpu.CompilerParams(
                    dimension_semantics=(pltpu.CORE_PARALLEL,)),
            )
            x = jnp.zeros((2, 8, 128), jnp.float32)
            y = jax.block_until_ready(f(x))
            _CORE_PARALLEL_OK = bool(jnp.allclose(y, x + 1.0))
        except Exception:
            _CORE_PARALLEL_OK = False
    return _CORE_PARALLEL_OK


def _vmem_limit_bytes(np_pad, dp, num_layers):
    # resident A' + double-buffered operands/outputs + live f32 activations.
    a_b = 2 * np_pad * np_pad * 2                 # bf16 A', pipeline double-buffer
    x_b = 2 * np_pad * dp * 4
    w_b = 2 * 2 * num_layers * dp * dp * 2        # W1 + W2 blocks, double-buffered
    bn_b = 2 * 4 * num_layers * dp * 4
    h_b = 2 * np_pad * dp * 4
    gh_b = 2 * num_layers * dp * 4
    act_b = 6 * np_pad * dp * 4                   # working-set headroom in the body
    need = a_b + x_b + w_b + bn_b + h_b + gh_b + act_b + (2 << 20)
    # cap at 64 MiB so the limit is valid on v7x's per-core VMEM as well.
    return int(min(max(need, 16 << 20), 64 << 20))


# --------------------------------------------------------------------------
# Fused kernel: both encoders (grid axis e in {online, target}), all layers.
#   per layer: GINConv(eps=0, sum-agg; self term folded into A') -> Linear
#              -> BN -> ReLU -> Linear -> BN -> ReLU, plus SumPooling.
# --------------------------------------------------------------------------
def _cg_encoder_kernel(num_layers, n_real, a_ref, x_ref, w1_ref, w2_ref,
                       g1_ref, b1_ref, g2_ref, b2_ref, h_ref, gh_ref):
    # a_ref : (NP, NP) bf16  A' = A + I   -- shared block, resident both steps
    # x_ref : (1, NP, DP) f32
    # w1/w2 : (1, L, DP, DP) bf16
    # g*/b* : (1, L, 1, DP) f32
    # h_ref : (1, NP, DP) f32     gh_ref : (1, L, DP) f32
    np_pad = x_ref.shape[1]
    inv_n = 1.0 / float(n_real)
    need_mask = np_pad > n_real
    if need_mask:
        rows = jax.lax.broadcasted_iota(jnp.int32, (np_pad, 1), 0)
        row_mask = (rows < n_real).astype(jnp.float32)

    def bn_relu(z, g, b):
        # fused training-mode BatchNorm (stats over the n_real real rows) + ReLU
        mu = jnp.sum(z, axis=0, keepdims=True) * inv_n
        ms = jnp.sum(z * z, axis=0, keepdims=True) * inv_n
        var = jnp.maximum(ms - mu * mu, 0.0)
        scale = g * jax.lax.rsqrt(var + BN_EPS)
        shift = b - mu * scale
        out = jnp.maximum(z * scale + shift, 0.0)
        if need_mask:
            out = out * row_mask        # keep padded rows exactly zero
        return out

    a = a_ref[...]                       # (NP, NP) bf16
    h = x_ref[0]                         # (NP, DP) f32

    for l in range(num_layers):          # static unroll (L is small and fixed)
        # GINConv, learn_eps=False (eps=0): self term folded into A' = A + I
        agg = jnp.dot(a, h.astype(jnp.bfloat16),
                      preferred_element_type=jnp.float32)
        # MLP linear 1 (bias=False) + MLP-internal BN + ReLU
        z1 = jnp.dot(agg.astype(jnp.bfloat16), w1_ref[0, l],
                     preferred_element_type=jnp.float32)
        z1 = bn_relu(z1, g1_ref[0, l], b1_ref[0, l])
        # MLP linear 2 (bias=False) + per-layer BN + ReLU
        z2 = jnp.dot(z1.astype(jnp.bfloat16), w2_ref[0, l],
                     preferred_element_type=jnp.float32)
        h = bn_relu(z2, g2_ref[0, l], b2_ref[0, l])
        # SumPooling (padded rows are zero) written straight to the output
        gh_ref[0, l:l + 1, :] = jnp.sum(h, axis=0, keepdims=True)
    h_ref[0] = h


def cg_encoders_pallas(a_plus_i, x_masked_pad, feat_pad, online_packed,
                       target_packed, num_layers, n_real, np_pad, dp):
    # stack the two encoder inputs / weights along a leading "encoder" axis
    x_all = jnp.stack([x_masked_pad, feat_pad], axis=0)     # (2, NP, DP) f32

    W1 = jnp.stack([online_packed[0], target_packed[0]])    # (2, L, DP, DP) bf16
    W2 = jnp.stack([online_packed[1], target_packed[1]])
    G1 = jnp.stack([online_packed[2], target_packed[2]])    # (2, L, 1, DP) f32
    B1 = jnp.stack([online_packed[3], target_packed[3]])
    G2 = jnp.stack([online_packed[4], target_packed[4]])
    B2 = jnp.stack([online_packed[5], target_packed[5]])

    a_bf = a_plus_i.astype(jnp.bfloat16)   # entries in {0,1,2}: exact in bf16

    flops = 2 * num_layers * (2 * np_pad * np_pad * dp + 2 * (2 * np_pad * dp * dp))
    bytes_accessed = (a_bf.size * 2 + x_all.size * 4
                      + (W1.size + W2.size) * 2
                      + (G1.size + B1.size + G2.size + B2.size) * 4
                      + (2 * np_pad * dp + 2 * num_layers * dp) * 4)
    cost = pl.CostEstimate(flops=flops,
                           transcendentals=2 * num_layers * 2 * dp,
                           bytes_accessed=bytes_accessed)

    enc_sem = pltpu.CORE_PARALLEL if _core_parallel_supported() else pltpu.ARBITRARY
    kernel = functools.partial(_cg_encoder_kernel, num_layers, n_real)

    h_all, gh_all = pl.pallas_call(
        kernel,
        out_shape=(jax.ShapeDtypeStruct((2, np_pad, dp), jnp.float32),
                   jax.ShapeDtypeStruct((2, num_layers, dp), jnp.float32)),
        grid=(2,),
        in_specs=[
            pl.BlockSpec((np_pad, np_pad), lambda e: (0, 0)),   # A': one DMA, resident
            pl.BlockSpec((1, np_pad, dp), lambda e: (e, 0, 0)),
            pl.BlockSpec((1, num_layers, dp, dp), lambda e: (e, 0, 0, 0)),
            pl.BlockSpec((1, num_layers, dp, dp), lambda e: (e, 0, 0, 0)),
            pl.BlockSpec((1, num_layers, 1, dp), lambda e: (e, 0, 0, 0)),
            pl.BlockSpec((1, num_layers, 1, dp), lambda e: (e, 0, 0, 0)),
            pl.BlockSpec((1, num_layers, 1, dp), lambda e: (e, 0, 0, 0)),
            pl.BlockSpec((1, num_layers, 1, dp), lambda e: (e, 0, 0, 0)),
        ],
        out_specs=(pl.BlockSpec((1, np_pad, dp), lambda e: (e, 0, 0)),
                   pl.BlockSpec((1, num_layers, dp), lambda e: (e, 0, 0))),
        compiler_params=pltpu.CompilerParams(
            dimension_semantics=(enc_sem,),
            vmem_limit_bytes=_vmem_limit_bytes(np_pad, dp, num_layers)),
        cost_estimate=cost,
    )(a_bf, x_all, W1, W2, G1, B1, G2, B2)
    return h_all, gh_all


# --------------------------------------------------------------------------
# Plain-JAX glue: parameter packing, masking, SCE loss (alpha=1), CG forward
# --------------------------------------------------------------------------
def init_encoder_params(key, in_hidden, out_hidden, hidden, layers):
    params = []
    d_in = in_hidden
    for _ in range(layers):
        key, k1, k2 = jax.random.split(key, 3)
        w1t = jax.random.normal(k1, (d_in, out_hidden), jnp.float32) * 0.1
        w2t = jax.random.normal(k2, (out_hidden, hidden), jnp.float32) * 0.1
        g1 = jnp.ones((1, out_hidden), jnp.float32)   # BatchNorm1d weight
        b1 = jnp.zeros((1, out_hidden), jnp.float32)  # BatchNorm1d bias
        g2 = jnp.ones((1, hidden), jnp.float32)       # layer BatchNorm weight
        b2 = jnp.zeros((1, hidden), jnp.float32)      # layer BatchNorm bias
        params.append((w1t, w2t, g1, b1, g2, b2))
        d_in = hidden
    return params


def pack_encoder_params(params, dp):
    """Zero-pad every per-layer parameter to DP lanes and stack over layers.

    Zero weight rows/cols + zero gamma/beta keep the padded lanes exactly 0
    through every layer, so padding is semantics-preserving."""
    num_layers = len(params)
    W1 = jnp.zeros((num_layers, dp, dp), jnp.float32)
    W2 = jnp.zeros((num_layers, dp, dp), jnp.float32)
    G1 = jnp.zeros((num_layers, 1, dp), jnp.float32)
    B1 = jnp.zeros((num_layers, 1, dp), jnp.float32)
    G2 = jnp.zeros((num_layers, 1, dp), jnp.float32)
    B2 = jnp.zeros((num_layers, 1, dp), jnp.float32)
    for l, (w1t, w2t, g1, b1, g2, b2) in enumerate(params):
        W1 = W1.at[l, :w1t.shape[0], :w1t.shape[1]].set(w1t)
        W2 = W2.at[l, :w2t.shape[0], :w2t.shape[1]].set(w2t)
        G1 = G1.at[l, :, :g1.shape[1]].set(g1)
        B1 = B1.at[l, :, :b1.shape[1]].set(b1)
        G2 = G2.at[l, :, :g2.shape[1]].set(g2)
        B2 = B2.at[l, :, :b2.shape[1]].set(b2)
    return (W1.astype(jnp.bfloat16), W2.astype(jnp.bfloat16), G1, B1, G2, B2)


def sce_loss(x, y):
    # criterion = partial(sce_loss, alpha=1): mean_i (1 - cos(x_i, y_i)).
    xn = x / jnp.maximum(jnp.sqrt(jnp.sum(x * x, axis=-1, keepdims=True)), 1e-12)
    yn = y / jnp.maximum(jnp.sqrt(jnp.sum(y * y, axis=-1, keepdims=True)), 1e-12)
    return jnp.mean(1.0 - jnp.sum(xn * yn, axis=-1))


def cg_forward(online_params, target_params, enc_mask_token, a, feat,
               key, *, rate, alpha):
    n, in_hidden = feat.shape
    num_layers = len(online_params)
    out_hidden = online_params[0][0].shape[1]
    hidden = online_params[0][1].shape[1]
    dp = max(LANE, _round_up(max(in_hidden, out_hidden, hidden), LANE))
    np_pad = max(LANE, _round_up(n, LANE))

    # mask(): randperm, take first int(rate * N) nodes
    perm = jax.random.permutation(key, n)
    num_mask = int(rate * n)
    mask_nodes = perm[:num_mask]

    # x[mask] = 0.0 ; x[mask] += enc_mask_token
    x = feat.at[mask_nodes].set(0.0)
    x = x.at[mask_nodes].add(enc_mask_token[0])

    def pad2(z):
        return jnp.pad(z, ((0, np_pad - z.shape[0]), (0, dp - z.shape[1])))

    x_pad, feat_pad = pad2(x), pad2(feat)

    # A' = A + I (GIN eps=0 self term folded in), zero-padded to (NP, NP)
    a_pad = jnp.zeros((np_pad, np_pad), jnp.float32).at[:n, :n].set(
        a.astype(jnp.float32))
    a_pad = a_pad.at[jnp.arange(n), jnp.arange(n)].add(1.0)

    on_packed = pack_encoder_params(online_params, dp)
    tg_packed = pack_encoder_params(target_params, dp)

    h_all, gh_all = cg_encoders_pallas(a_pad, x_pad, feat_pad, on_packed,
                                       tg_packed, num_layers, n, np_pad, dp)
    h1 = h_all[0]
    h2 = jax.lax.stop_gradient(h_all[1])             # target encoder: no_grad/frozen
    gh1 = gh_all[0].reshape(1, -1)
    gh2 = jax.lax.stop_gradient(gh_all[1].reshape(1, -1))

    # padded lanes/rows are exactly zero -> cosine over padded vectors == unpadded
    loss = (sce_loss(h1[mask_nodes], h2[mask_nodes]) * alpha
            + sce_loss(gh1, gh2) * (1.0 - alpha))
    return loss


if __name__ == "__main__":
    # CG(in_hidden=8, out_hidden=32, rate=0.5, hidden=16, alpha=0.7, layers=2)
    N, IN_HIDDEN, OUT_HIDDEN, HIDDEN, LAYERS = 16, 8, 32, 16, 2
    RATE, ALPHA = 0.5, 0.7

    root = jax.random.PRNGKey(0)
    k_feat, k_adj, k_on, k_tg, k_mask = jax.random.split(root, 5)

    # node features
    feat = jax.random.normal(k_feat, (N, IN_HIDDEN), jnp.float32)

    # deterministic undirected graph (dense adjacency, no self-loops)
    a = (jax.random.uniform(k_adj, (N, N)) < 0.3).astype(jnp.float32)
    a = jnp.maximum(a, a.T)
    a = a * (1.0 - jnp.eye(N, dtype=jnp.float32))

    online_params = init_encoder_params(k_on, IN_HIDDEN, OUT_HIDDEN, HIDDEN, LAYERS)
    target_params = init_encoder_params(k_tg, IN_HIDDEN, OUT_HIDDEN, HIDDEN, LAYERS)
    enc_mask_token = jnp.zeros((1, IN_HIDDEN), jnp.float32)  # nn.Parameter(torch.zeros(1, in_hidden))

    # probe CORE_PARALLEL support outside of any trace (cached for the real kernel)
    _core_parallel_supported()

    loss_fn = jax.jit(functools.partial(cg_forward, rate=RATE, alpha=ALPHA))
    loss = loss_fn(online_params, target_params, enc_mask_token, a, feat, k_mask)
    loss = jax.block_until_ready(loss)
    assert loss.shape == () and bool(jnp.isfinite(loss))
    print("KERNEL_OK")
</pallas_src>

<mosaic_0001>
module attributes {stable_mosaic.version = 11 : i64} {
  func.func @_probe(%arg0: i32, %arg1: memref<1x8x128xf32, #tpu.memory_space<vmem>>, %arg2: memref<1x8x128xf32, #tpu.memory_space<vmem>>) attributes {dimension_semantics = [#tpu.dimension_semantics<core_parallel>], iteration_bounds = array<i64: 2>, scalar_prefetch = 0 : i64, scratch_operands = 0 : i64, tpu.core_type = #tpu.core_type<tc>, window_params = [{transform_indices = @transform_0, window_bounds = array<i64: 1, 8, 128>}, {transform_indices = @transform_1, window_bounds = array<i64: 1, 8, 128>}]} {
    %c0 = arith.constant 0 : index
    %c0_0 = arith.constant 0 : index
    %c0_1 = arith.constant 0 : index
    %0 = vector.load %arg1[%c0, %c0_0, %c0_1] : memref<1x8x128xf32, #tpu.memory_space<vmem>>, vector<1x8x128xf32>
    %cst = arith.constant 1.000000e+00 : f32
    %1 = vector.broadcast %cst : f32 to vector<1x8x128xf32>
    %2 = arith.addf %0, %1 : vector<1x8x128xf32>
    %c0_2 = arith.constant 0 : index
    %c0_3 = arith.constant 0 : index
    %c0_4 = arith.constant 0 : index
    %3 = vector.load %arg2[%c0_2, %c0_3, %c0_4] : memref<1x8x128xf32, #tpu.memory_space<vmem>>, vector<1x8x128xf32>
    tpu.vector_store %arg2[%c0_2, %c0_3, %c0_4], %2 {strides = array<i32>} : memref<1x8x128xf32, #tpu.memory_space<vmem>>, vector<1x8x128xf32>,
    return
  }
  func.func @transform_0(%arg0: i32) -> (i32, i32, i32) {
    %c0_i32 = arith.constant 0 : i32
    %c0_i32_0 = arith.constant 0 : i32
    %c0_i32_1 = arith.constant 0 : i32
    return %arg0, %c0_i32, %c0_i32_0 : i32, i32, i32
  }
  func.func @transform_1(%arg0: i32) -> (i32, i32, i32) {
    %c0_i32 = arith.constant 0 : i32
    %c0_i32_0 = arith.constant 0 : i32
    %c0_i32_1 = arith.constant 0 : i32
    return %arg0, %c0_i32, %c0_i32_0 : i32, i32, i32
  }
}

module attributes {stable_mosaic.version = 11 : i64} {
  func.func @_cg_encoder_kernel(%arg0: i32, %arg1: memref<128x128xbf16, #tpu.memory_space<vmem>>, %arg2: memref<1x128x128xf32, #tpu.memory_space<vmem>>, %arg3: memref<1x2x128x128xbf16, #tpu.memory_space<vmem>>, %arg4: memref<1x2x128x128xbf16, #tpu.memory_space<vmem>>, %arg5: memref<1x2x1x128xf32, #tpu.memory_space<vmem>>, %arg6: memref<1x2x1x128xf32, #tpu.memory_space<vmem>>, %arg7: memref<1x2x1x128xf32, #tpu.memory_space<vmem>>, %arg8: memref<1x2x1x128xf32, #tpu.memory_space<vmem>>, %arg9: memref<1x128x128xf32, #tpu.memory_space<vmem>>, %arg10: memref<1x2x128xf32, #tpu.memory_space<vmem>>) attributes {dimension_semantics = [#tpu.dimension_semantics<arbitrary>], iteration_bounds = array<i64: 2>, scalar_prefetch = 0 : i64, scratch_operands = 0 : i64, tpu.core_type = #tpu.core_type<tc>, window_params = [{pipeline_mode = #tpu.pipeline_mode<synchronous>, transform_indices = @transform_0, window_bounds = array<i64: 128, 128>}, {transform_indices = @transform_1, window_bounds = array<i64: 1, 128, 128>}, {transform_indices = @transform_2, window_bounds = array<i64: 1, 2, 128, 128>}, {transform_indices = @transform_3, window_bounds = array<i64: 1, 2, 128, 128>}, {transform_indices = @transform_4, window_bounds = array<i64: 1, 2, 1, 128>}, {transform_indices = @transform_5, window_bounds = array<i64: 1, 2, 1, 128>}, {transform_indices = @transform_6, window_bounds = array<i64: 1, 2, 1, 128>}, {transform_indices = @transform_7, window_bounds = array<i64: 1, 2, 1, 128>}, {transform_indices = @transform_8, window_bounds = array<i64: 1, 128, 128>}, {transform_indices = @transform_9, window_bounds = array<i64: 1, 2, 128>}]} {
    %0 = tpu.iota {dimensions = array<i32: 0>} : vector<128x1xi32>
    %c16_i32 = arith.constant 16 : i32
    %1 = vector.broadcast %c16_i32 : i32 to vector<128x1xi32>
    %2 = arith.cmpi slt, %0, %1 : vector<128x1xi32>
    %3 = arith.extui %2 : vector<128x1xi1> to vector<128x1xi32>
    %4 = arith.sitofp %3 : vector<128x1xi32> to vector<128x1xf32>
    %c0 = arith.constant 0 : index
    %c0_0 = arith.constant 0 : index
    %5 = vector.load %arg1[%c0, %c0_0] : memref<128x128xbf16, #tpu.memory_space<vmem>>, vector<128x128xbf16>
    %c0_1 = arith.constant 0 : index
    %c0_2 = arith.constant 0 : index
    %c0_3 = arith.constant 0 : index
    %6 = vector.load %arg2[%c0_1, %c0_2, %c0_3] : memref<1x128x128xf32, #tpu.memory_space<vmem>>, vector<1x128x128xf32>
    %7 = vector.shape_cast %6 : vector<1x128x128xf32> to vector<128x128xf32>
    %8 = arith.truncf %7 : vector<128x128xf32> to vector<128x128xbf16>
    %cst = arith.constant dense<0.000000e+00> : vector<128x128xf32>
    %9 = tpu.matmul %5, %8, %cst {dimension_numbers = #tpu.dot_dimension_numbers<[1], [0], [0], [1], [0, 0, 1, 1], [], []>} : vector<128x128xbf16>, vector<128x128xbf16>, vector<128x128xf32> -> vector<128x128xf32>
    %10 = arith.truncf %9 : vector<128x128xf32> to vector<128x128xbf16>
    %c0_4 = arith.constant 0 : index
    %c0_5 = arith.constant 0 : index
    %c0_6 = arith.constant 0 : index
    %c0_7 = arith.constant 0 : index
    %11 = vector.load %arg3[%c0_4, %c0_5, %c0_6, %c0_7] : memref<1x2x128x128xbf16, #tpu.memory_space<vmem>>, vector<1x1x128x128xbf16>
    %12 = vector.shape_cast %11 : vector<1x1x128x128xbf16> to vector<128x128xbf16>
    %cst_8 = arith.constant dense<0.000000e+00> : vector<128x128xf32>
    %13 = tpu.matmul %10, %12, %cst_8 {dimension_numbers = #tpu.dot_dimension_numbers<[1], [0], [0], [1], [0, 0, 1, 1], [], []>} : vector<128x128xbf16>, vector<128x128xbf16>, vector<128x128xf32> -> vector<128x128xf32>
    %c0_9 = arith.constant 0 : index
    %c0_10 = arith.constant 0 : index
    %c0_11 = arith.constant 0 : index
    %c0_12 = arith.constant 0 : index
    %14 = vector.load %arg5[%c0_9, %c0_10, %c0_11, %c0_12] : memref<1x2x1x128xf32, #tpu.memory_space<vmem>>, vector<1x1x1x128xf32>
    %15 = vector.shape_cast %14 : vector<1x1x1x128xf32> to vector<1x128xf32>
    %c0_13 = arith.constant 0 : index
    %c0_14 = arith.constant 0 : index
    %c0_15 = arith.constant 0 : index
    %c0_16 = arith.constant 0 : index
    %16 = vector.load %arg6[%c0_13, %c0_14, %c0_15, %c0_16] : memref<1x2x1x128xf32, #tpu.memory_space<vmem>>, vector<1x1x1x128xf32>
    %17 = vector.shape_cast %16 : vector<1x1x1x128xf32> to vector<1x128xf32>
    %cst_17 = arith.constant dense<0.000000e+00> : vector<128xf32>
    %18 = vector.multi_reduction <add>, %13, %cst_17 [0] : vector<128x128xf32> to vector<128xf32>
    %19 = vector.shape_cast %18 : vector<128xf32> to vector<1x128xf32>
    %cst_18 = arith.constant 6.250000e-02 : f32
    %20 = vector.broadcast %cst_18 : f32 to vector<1x128xf32>
    %21 = arith.mulf %19, %20 : vector<1x128xf32>
    %22 = arith.mulf %13, %13 : vector<128x128xf32>
    %cst_19 = arith.constant dense<0.000000e+00> : vector<128xf32>
    %23 = vector.multi_reduction <add>, %22, %cst_19 [0] : vector<128x128xf32> to vector<128xf32>
    %24 = vector.shape_cast %23 : vector<128xf32> to vector<1x128xf32>
    %cst_20 = arith.constant 6.250000e-02 : f32
    %25 = vector.broadcast %cst_20 : f32 to vector<1x128xf32>
    %26 = arith.mulf %24, %25 : vector<1x128xf32>
    %27 = arith.mulf %21, %21 : vector<1x128xf32>
    %28 = arith.subf %26, %27 : vector<1x128xf32>
    %cst_21 = arith.constant 0.000000e+00 : f32
    %29 = vector.broadcast %cst_21 : f32 to vector<1x128xf32>
    %30 = arith.maximumf %28, %29 : vector<1x128xf32>
    %cst_22 = arith.constant 9.99999974E-6 : f32
    %31 = vector.broadcast %cst_22 : f32 to vector<1x128xf32>
    %32 = arith.addf %30, %31 : vector<1x128xf32>
    %33 = math.rsqrt %32 : vector<1x128xf32>
    %34 = arith.mulf %15, %33 : vector<1x128xf32>
    %35 = arith.mulf %21, %34 : vector<1x128xf32>
    %36 = arith.subf %17, %35 : vector<1x128xf32>
    %37 = vector.broadcast %34 : vector<1x128xf32> to vector<128x128xf32>
    %38 = arith.mulf %13, %37 : vector<128x128xf32>
    %39 = vector.broadcast %36 : vector<1x128xf32> to vector<128x128xf32>
    %40 = arith.addf %38, %39 : vector<128x128xf32>
    %cst_23 = arith.constant 0.000000e+00 : f32
    %41 = vector.broadcast %cst_23 : f32 to vector<128x128xf32>
    %42 = arith.maximumf %40, %41 : vector<128x128xf32>
    %43 = vector.broadcast %4 : vector<128x1xf32> to vector<128x128xf32>
    %44 = arith.mulf %42, %43 : vector<128x128xf32>
    %45 = arith.truncf %44 : vector<128x128xf32> to vector<128x128xbf16>
    %c0_24 = arith.constant 0 : index
    %c0_25 = arith.constant 0 : index
    %c0_26 = arith.constant 0 : index
    %c0_27 = arith.constant 0 : index
    %46 = vector.load %arg4[%c0_24, %c0_25, %c0_26, %c0_27] : memref<1x2x128x128xbf16, #tpu.memory_space<vmem>>, vector<1x1x128x128xbf16>
    %47 = vector.shape_cast %46 : vector<1x1x128x128xbf16> to vector<128x128xbf16>
    %cst_28 = arith.constant dense<0.000000e+00> : vector<128x128xf32>
    %48 = tpu.matmul %45, %47, %cst_28 {dimension_numbers = #tpu.dot_dimension_numbers<[1], [0], [0], [1], [0, 0, 1, 1], [], []>} : vector<128x128xbf16>, vector<128x128xbf16>, vector<128x128xf32> -> vector<128x128xf32>
    %c0_29 = arith.constant 0 : index
    %c0_30 = arith.constant 0 : index
    %c0_31 = arith.constant 0 : index
    %c0_32 = arith.constant 0 : index
    %49 = vector.load %arg7[%c0_29, %c0_30, %c0_31, %c0_32] : memref<1x2x1x128xf32, #tpu.memory_space<vmem>>, vector<1x1x1x128xf32>
    %50 = vector.shape_cast %49 : vector<1x1x1x128xf32> to vector<1x128xf32>
    %c0_33 = arith.constant 0 : index
    %c0_34 = arith.constant 0 : index
    %c0_35 = arith.constant 0 : index
    %c0_36 = arith.constant 0 : index
    %51 = vector.load %arg8[%c0_33, %c0_34, %c0_35, %c0_36] : memref<1x2x1x128xf32, #tpu.memory_space<vmem>>, vector<1x1x1x128xf32>
    %52 = vector.shape_cast %51 : vector<1x1x1x128xf32> to vector<1x128xf32>
    %cst_37 = arith.constant dense<0.000000e+00> : vector<128xf32>
    %53 = vector.multi_reduction <add>, %48, %cst_37 [0] : vector<128x128xf32> to vector<128xf32>
    %54 = vector.shape_cast %53 : vector<128xf32> to vector<1x128xf32>
    %cst_38 = arith.constant 6.250000e-02 : f32
    %55 = vector.broadcast %cst_38 : f32 to vector<1x128xf32>
    %56 = arith.mulf %54, %55 : vector<1x128xf32>
    %57 = arith.mulf %48, %48 : vector<128x128xf32>
    %cst_39 = arith.constant dense<0.000000e+00> : vector<128xf32>
    %58 = vector.multi_reduction <add>, %57, %cst_39 [0] : vector<128x128xf32> to vector<128xf32>
    %59 = vector.shape_cast %58 : vector<128xf32> to vector<1x128xf32>
    %cst_40 = arith.constant 6.250000e-02 : f32
    %60 = vector.broadcast %cst_40 : f32 to vector<1x128xf32>
    %61 = arith.mulf %59, %60 : vector<1x128xf32>
    %62 = arith.mulf %56, %56 : vector<1x128xf32>
    %63 = arith.subf %61, %62 : vector<1x128xf32>
    %cst_41 = arith.constant 0.000000e+00 : f32
    %64 = vector.broadcast %cst_41 : f32 to vector<1x128xf32>
    %65 = arith.maximumf %63, %64 : vector<1x128xf32>
    %cst_42 = arith.constant 9.99999974E-6 : f32
    %66 = vector.broadcast %cst_42 : f32 to vector<1x128xf32>
    %67 = arith.addf %65, %66 : vector<1x128xf32>
    %68 = math.rsqrt %67 : vector<1x128xf32>
    %69 = arith.mulf %50, %68 : vector<1x128xf32>
    %70 = arith.mulf %56, %69 : vector<1x128xf32>
    %71 = arith.subf %52, %70 : vector<1x128xf32>
    %72 = vector.broadcast %69 : vector<1x128xf32> to vector<128x128xf32>
    %73 = arith.mulf %48, %72 : vector<128x128xf32>
    %74 = vector.broadcast %71 : vector<1x128xf32> to vector<128x128xf32>
    %75 = arith.addf %73, %74 : vector<128x128xf32>
    %cst_43 = arith.constant 0.000000e+00 : f32
    %76 = vector.broadcast %cst_43 : f32 to vector<128x128xf32>
    %77 = arith.maximumf %75, %76 : vector<128x128xf32>
    %78 = vector.broadcast %4 : vector<128x1xf32> to vector<128x128xf32>
    %79 = arith.mulf %77, %78 : vector<128x128xf32>
    %cst_44 = arith.constant dense<0.000000e+00> : vector<128xf32>
    %80 = vector.multi_reduction <add>, %79, %cst_44 [0] : vector<128x128xf32> to vector<128xf32>
    %81 = vector.shape_cast %80 : vector<128xf32> to vector<1x128xf32>
    %c0_45 = arith.constant 0 : index
    %c0_46 = arith.constant 0 : index
    %c0_47 = arith.constant 0 : index
    %82 = vector.load %arg10[%c0_45, %c0_46, %c0_47] : memref<1x2x128xf32, #tpu.memory_space<vmem>>, vector<1x1x128xf32>
    %83 = vector.shape_cast %82 : vector<1x1x128xf32> to vector<1x128xf32>
    %84 = vector.shape_cast %81 : vector<1x128xf32> to vector<1x1x128xf32>
    tpu.vector_store %arg10[%c0_45, %c0_46, %c0_47], %84 {strides = array<i32>} : memref<1x2x128xf32, #tpu.memory_space<vmem>>, vector<1x1x128xf32>,
    %85 = arith.truncf %79 : vector<128x128xf32> to vector<128x128xbf16>
    %cst_48 = arith.constant dense<0.000000e+00> : vector<128x128xf32>
    %86 = tpu.matmul %5, %85, %cst_48 {dimension_numbers = #tpu.dot_dimension_numbers<[1], [0], [0], [1], [0, 0, 1, 1], [], []>} : vector<128x128xbf16>, vector<128x128xbf16>, vector<128x128xf32> -> vector<128x128xf32>
    %87 = arith.truncf %86 : vector<128x128xf32> to vector<128x128xbf16>
    %c0_49 = arith.constant 0 : index
    %c1 = arith.constant 1 : index
    %c0_50 = arith.constant 0 : index
    %c0_51 = arith.constant 0 : index
    %88 = vector.load %arg3[%c0_49, %c1, %c0_50, %c0_51] : memref<1x2x128x128xbf16, #tpu.memory_space<vmem>>, vector<1x1x128x128xbf16>
    %89 = vector.shape_cast %88 : vector<1x1x128x128xbf16> to vector<128x128xbf16>
    %cst_52 = arith.constant dense<0.000000e+00> : vector<128x128xf32>
    %90 = tpu.matmul %87, %89, %cst_52 {dimension_numbers = #tpu.dot_dimension_numbers<[1], [0], [0], [1], [0, 0, 1, 1], [], []>} : vector<128x128xbf16>, vector<128x128xbf16>, vector<128x128xf32> -> vector<128x128xf32>
    %c0_53 = arith.constant 0 : index
    %c1_54 = arith.constant 1 : index
    %c0_55 = arith.constant 0 : index
    %c0_56 = arith.constant 0 : index
    %91 = vector.load %arg5[%c0_53, %c1_54, %c0_55, %c0_56] : memref<1x2x1x128xf32, #tpu.memory_space<vmem>>, vector<1x1x1x128xf32>
    %92 = vector.shape_cast %91 : vector<1x1x1x128xf32> to vector<1x128xf32>
    %c0_57 = arith.constant 0 : index
    %c1_58 = arith.constant 1 : index
    %c0_59 = arith.constant 0 : index
    %c0_60 = arith.constant 0 : index
    %93 = vector.load %arg6[%c0_57, %c1_58, %c0_59, %c0_60] : memref<1x2x1x128xf32, #tpu.memory_space<vmem>>, vector<1x1x1x128xf32>
    %94 = vector.shape_cast %93 : vector<1x1x1x128xf32> to vector<1x128xf32>
    %cst_61 = arith.constant dense<0.000000e+00> : vector<128xf32>
    %95 = vector.multi_reduction <add>, %90, %cst_61 [0] : vector<128x128xf32> to vector<128xf32>
    %96 = vector.shape_cast %95 : vector<128xf32> to vector<1x128xf32>
    %cst_62 = arith.constant 6.250000e-02 : f32
    %97 = vector.broadcast %cst_62 : f32 to vector<1x128xf32>
    %98 = arith.mulf %96, %97 : vector<1x128xf32>
    %99 = arith.mulf %90, %90 : vector<128x128xf32>
    %cst_63 = arith.constant dense<0.000000e+00> : vector<128xf32>
    %100 = vector.multi_reduction <add>, %99, %cst_63 [0] : vector<128x128xf32> to vector<128xf32>
    %101 = vector.shape_cast %100 : vector<128xf32> to vector<1x128xf32>
    %cst_64 = arith.constant 6.250000e-02 : f32
    %102 = vector.broadcast %cst_64 : f32 to vector<1x128xf32>
    %103 = arith.mulf %101, %102 : vector<1x128xf32>
    %104 = arith.mulf %98, %98 : vector<1x128xf32>
    %105 = arith.subf %103, %104 : vector<1x128xf32>
    %cst_65 = arith.constant 0.000000e+00 : f32
    %106 = vector.broadcast %cst_65 : f32 to vector<1x128xf32>
    %107 = arith.maximumf %105, %106 : vector<1x128xf32>
    %cst_66 = arith.constant 9.99999974E-6 : f32
    %108 = vector.broadcast %cst_66 : f32 to vector<1x128xf32>
    %109 = arith.addf %107, %108 : vector<1x128xf32>
    %110 = math.rsqrt %109 : vector<1x128xf32>
    %111 = arith.mulf %92, %110 : vector<1x128xf32>
    %112 = arith.mulf %98, %111 : vector<1x128xf32>
    %113 = arith.subf %94, %112 : vector<1x128xf32>
    %114 = vector.broadcast %111 : vector<1x128xf32> to vector<128x128xf32>
    %115 = arith.mulf %90, %114 : vector<128x128xf32>
    %116 = vector.broadcast %113 : vector<1x128xf32> to vector<128x128xf32>
    %117 = arith.addf %115, %116 : vector<128x128xf32>
    %cst_67 = arith.constant 0.000000e+00 : f32
    %118 = vector.broadcast %cst_67 : f32 to vector<128x128xf32>
    %119 = arith.maximumf %117, %118 : vector<128x128xf32>
    %120 = vector.broadcast %4 : vector<128x1xf32> to vector<128x128xf32>
    %121 = arith.mulf %119, %120 : vector<128x128xf32>
    %122 = arith.truncf %121 : vector<128x128xf32> to vector<128x128xbf16>
    %c0_68 = arith.constant 0 : index
    %c1_69 = arith.constant 1 : index
    %c0_70 = arith.constant 0 : index
    %c0_71 = arith.constant 0 : index
    %123 = vector.load %arg4[%c0_68, %c1_69, %c0_70, %c0_71] : memref<1x2x128x128xbf16, #tpu.memory_space<vmem>>, vector<1x1x128x128xbf16>
    %124 = vector.shape_cast %123 : vector<1x1x128x128xbf16> to vector<128x128xbf16>
    %cst_72 = arith.constant dense<0.000000e+00> : vector<128x128xf32>
    %125 = tpu.matmul %122, %124, %cst_72 {dimension_numbers = #tpu.dot_dimension_numbers<[1], [0], [0], [1], [0, 0, 1, 1], [], []>} : vector<128x128xbf16>, vector<128x128xbf16>, vector<128x128xf32> -> vector<128x128xf32>
    %c0_73 = arith.constant 0 : index
    %c1_74 = arith.constant 1 : index
    %c0_75 = arith.constant 0 : index
    %c0_76 = arith.constant 0 : index
    %126 = vector.load %arg7[%c0_73, %c1_74, %c0_75, %c0_76] : memref<1x2x1x128xf32, #tpu.memory_space<vmem>>, vector<1x1x1x128xf32>
    %127 = vector.shape_cast %126 : vector<1x1x1x128xf32> to vector<1x128xf32>
    %c0_77 = arith.constant 0 : index
    %c1_78 = arith.constant 1 : index
    %c0_79 = arith.constant 0 : index
    %c0_80 = arith.constant 0 : index
    %128 = vector.load %arg8[%c0_77, %c1_78, %c0_79, %c0_80] : memref<1x2x1x128xf32, #tpu.memory_space<vmem>>, vector<1x1x1x128xf32>
    %129 = vector.shape_cast %128 : vector<1x1x1x128xf32> to vector<1x128xf32>
    %cst_81 = arith.constant dense<0.000000e+00> : vector<128xf32>
    %130 = vector.multi_reduction <add>, %125, %cst_81 [0] : vector<128x128xf32> to vector<128xf32>
    %131 = vector.shape_cast %130 : vector<128xf32> to vector<1x128xf32>
    %cst_82 = arith.constant 6.250000e-02 : f32
    %132 = vector.broadcast %cst_82 : f32 to vector<1x128xf32>
    %133 = arith.mulf %131, %132 : vector<1x128xf32>
    %134 = arith.mulf %125, %125 : vector<128x128xf32>
    %cst_83 = arith.constant dense<0.000000e+00> : vector<128xf32>
    %135 = vector.multi_reduction <add>, %134, %cst_83 [0] : vector<128x128xf32> to vector<128xf32>
    %136 = vector.shape_cast %135 : vector<128xf32> to vector<1x128xf32>
    %cst_84 = arith.constant 6.250000e-02 : f32
    %137 = vector.broadcast %cst_84 : f32 to vector<1x128xf32>
    %138 = arith.mulf %136, %137 : vector<1x128xf32>
    %139 = arith.mulf %133, %133 : vector<1x128xf32>
    %140 = arith.subf %138, %139 : vector<1x128xf32>
    %cst_85 = arith.constant 0.000000e+00 : f32
    %141 = vector.broadcast %cst_85 : f32 to vector<1x128xf32>
    %142 = arith.maximumf %140, %141 : vector<1x128xf32>
    %cst_86 = arith.constant 9.99999974E-6 : f32
    %143 = vector.broadcast %cst_86 : f32 to vector<1x128xf32>
    %144 = arith.addf %142, %143 : vector<1x128xf32>
    %145 = math.rsqrt %144 : vector<1x128xf32>
    %146 = arith.mulf %127, %145 : vector<1x128xf32>
    %147 = arith.mulf %133, %146 : vector<1x128xf32>
    %148 = arith.subf %129, %147 : vector<1x128xf32>
    %149 = vector.broadcast %146 : vector<1x128xf32> to vector<128x128xf32>
    %150 = arith.mulf %125, %149 : vector<128x128xf32>
    %151 = vector.broadcast %148 : vector<1x128xf32> to vector<128x128xf32>
    %152 = arith.addf %150, %151 : vector<128x128xf32>
    %cst_87 = arith.constant 0.000000e+00 : f32
    %153 = vector.broadcast %cst_87 : f32 to vector<128x128xf32>
    %154 = arith.maximumf %152, %153 : vector<128x128xf32>
    %155 = vector.broadcast %4 : vector<128x1xf32> to vector<128x128xf32>
    %156 = arith.mulf %154, %155 : vector<128x128xf32>
    %cst_88 = arith.constant dense<0.000000e+00> : vector<128xf32>
    %157 = vector.multi_reduction <add>, %156, %cst_88 [0] : vector<128x128xf32> to vector<128xf32>
    %158 = vector.shape_cast %157 : vector<128xf32> to vector<1x128xf32>
    %c0_89 = arith.constant 0 : index
    %c1_90 = arith.constant 1 : index
    %c0_91 = arith.constant 0 : index
    %159 = vector.load %arg10[%c0_89, %c1_90, %c0_91] : memref<1x2x128xf32, #tpu.memory_space<vmem>>, vector<1x1x128xf32>
    %160 = vector.shape_cast %159 : vector<1x1x128xf32> to vector<1x128xf32>
    %161 = vector.shape_cast %158 : vector<1x128xf32> to vector<1x1x128xf32>
    tpu.vector_store %arg10[%c0_89, %c1_90, %c0_91], %161 {strides = array<i32>} : memref<1x2x128xf32, #tpu.memory_space<vmem>>, vector<1x1x128xf32>,
    %c0_92 = arith.constant 0 : index
    %c0_93 = arith.constant 0 : index
    %c0_94 = arith.constant 0 : index
    %162 = vector.load %arg9[%c0_92, %c0_93, %c0_94] : memref<1x128x128xf32, #tpu.memory_space<vmem>>, vector<1x128x128xf32>
    %163 = vector.shape_cast %162 : vector<1x128x128xf32> to vector<128x128xf32>
    %164 = vector.shape_cast %156 : vector<128x128xf32> to vector<1x128x128xf32>
    tpu.vector_store %arg9[%c0_92, %c0_93, %c0_94], %164 {strides = array<i32>} : memref<1x128x128xf32, #tpu.memory_space<vmem>>, vector<1x128x128xf32>,
    return
  }
  func.func @transform_0(%arg0: i32) -> (i32, i32) {
    %c0_i32 = arith.constant 0 : i32
    %c0_i32_0 = arith.constant 0 : i32
    %c0_i32_1 = arith.constant 0 : i32
    return %c0_i32, %c0_i32_0 : i32, i32
  }
  func.func @transform_1(%arg0: i32) -> (i32, i32, i32) {
    %c0_i32 = arith.constant 0 : i32
    %c0_i32_0 = arith.constant 0 : i32
    %c0_i32_1 = arith.constant 0 : i32
    return %arg0, %c0_i32, %c0_i32_0 : i32, i32, i32
  }
  func.func @transform_2(%arg0: i32) -> (i32, i32, i32, i32) {
    %c0_i32 = arith.constant 0 : i32
    %c0_i32_0 = arith.constant 0 : i32
    %c0_i32_1 = arith.constant 0 : i32
    %c0_i32_2 = arith.constant 0 : i32
    return %arg0, %c0_i32, %c0_i32_0, %c0_i32_1 : i32, i32, i32, i32
  }
  func.func @transform_3(%arg0: i32) -> (i32, i32, i32, i32) {
    %c0_i32 = arith.constant 0 : i32
    %c0_i32_0 = arith.constant 0 : i32
    %c0_i32_1 = arith.constant 0 : i32
    %c0_i32_2 = arith.constant 0 : i32
    return %arg0, %c0_i32, %c0_i32_0, %c0_i32_1 : i32, i32, i32, i32
  }
  func.func @transform_4(%arg0: i32) -> (i32, i32, i32, i32) {
    %c0_i32 = arith.constant 0 : i32
    %c0_i32_0 = arith.constant 0 : i32
    %c0_i32_1 = arith.constant 0 : i32
    %c0_i32_2 = arith.constant 0 : i32
    return %arg0, %c0_i32, %c0_i32_0, %c0_i32_1 : i32, i32, i32, i32
  }
  func.func @transform_5(%arg0: i32) -> (i32, i32, i32, i32) {
    %c0_i32 = arith.constant 0 : i32
    %c0_i32_0 = arith.constant 0 : i32
    %c0_i32_1 = arith.constant 0 : i32
    %c0_i32_2 = arith.constant 0 : i32
    return %arg0, %c0_i32, %c0_i32_0, %c0_i32_1 : i32, i32, i32, i32
  }
  func.func @transform_6(%arg0: i32) -> (i32, i32, i32, i32) {
    %c0_i32 = arith.constant 0 : i32
    %c0_i32_0 = arith.constant 0 : i32
    %c0_i32_1 = arith.constant 0 : i32
    %c0_i32_2 = arith.constant 0 : i32
    return %arg0, %c0_i32, %c0_i32_0, %c0_i32_1 : i32, i32, i32, i32
  }
  func.func @transform_7(%arg0: i32) -> (i32, i32, i32, i32) {
    %c0_i32 = arith.constant 0 : i32
    %c0_i32_0 = arith.constant 0 : i32
    %c0_i32_1 = arith.constant 0 : i32
    %c0_i32_2 = arith.constant 0 : i32
    return %arg0, %c0_i32, %c0_i32_0, %c0_i32_1 : i32, i32, i32, i32
  }
  func.func @transform_8(%arg0: i32) -> (i32, i32, i32) {
    %c0_i32 = arith.constant 0 : i32
    %c0_i32_0 = arith.constant 0 : i32
    %c0_i32_1 = arith.constant 0 : i32
    return %arg0, %c0_i32, %c0_i32_0 : i32, i32, i32
  }
  func.func @transform_9(%arg0: i32) -> (i32, i32, i32) {
    %c0_i32 = arith.constant 0 : i32
    %c0_i32_0 = arith.constant 0 : i32
    %c0_i32_1 = arith.constant 0 : i32
    return %arg0, %c0_i32, %c0_i32_0 : i32, i32, i32
  }
}

</mosaic_0001>

<bundles_post_ra>
// kernel: cg_forward.1
= control target key start
LH: loop header
LB: loop body
LE: loop exit
PB: predicated region body
PF: predicated region fallthrough
CT: control target
= control target key end

     0   :  { %s2365_s30 = smov 0   ;;  %s3022_s0 = inlined_call_operand.vmem [shape: bf16[128,128], index: 0, kind: input, shape index: {}]   ;;  %s3023_s1 = inlined_call_operand.vmem [shape: f32[2,128,128], index: 1, kind: input, shape index: {}]   ;;  %s3024_s2 = inlined_call_operand.vmem [shape: bf16[2,2,128,128], index: 2, kind: input, shape index: {}]   ;;  %s3025_s3 = inlined_call_operand.vmem [shape: bf16[2,2,128,128], index: 3, kind: input, shape index: {}]   ;;  %s3026_s4 = inlined_call_operand.vmem [shape: f32[2,2,1,128], index: 4, kind: input, shape index: {}]   ;;  %s3027_s5 = inlined_call_operand.vmem [shape: f32[2,2,1,128], index: 5, kind: input, shape index: {}]   ;;  %s3028_s6 = inlined_call_operand.vmem [shape: f32[2,2,1,128], index: 6, kind: input, shape index: {}]   ;;  %s3029_s7 = inlined_call_operand.vmem [shape: f32[2,2,1,128], index: 7, kind: input, shape index: {}]   ;;  %s3030_s8 = inlined_call_operand.vmem [shape: f32[2,128,128], index: 8, kind: output, shape index: {0}]   ;;  %s3031_s9 = inlined_call_operand.vmem [shape: f32[2,2,128], index: 9, kind: output, shape index: {1}]  }
   0x1 LB: > { %s2015_s10 = sadd.s32 4294967295, %s2313_s30   ;;  %p2019_p0 = scmp.ge.s32.totalorder %s2313_s30, 1  ;;  %s2313_s30 = sphi %s2365_s30, %s20_s30  }
   0x2   : > { %p346_p1 = scmp.lt.s32.totalorder %s2313_s30, 3 }
   0x4   : > { %p347_p2 = pnand %p2019_p0, %p346_p1 }
   0x5   : > { %p412_p3 = scmp.lt.s32.totalorder (!%p347_p2), %s2015_s10, 1 }
   0x6   : > { %350 = sbr.rel (%p347_p2) target bundleno = 1571 (0x623), region = 52 }
   0xb   : > { %s3033_s10 = smov (!%p412_p3, %s2015_s10), 1  ;;  %v2403_v24 = vld [vmem:[%s3022_s0] sm:$0xff]  ;;  %v2415_v26 = vld [vmem:[%s3022_s0 + $0x8] sm:$0xff]  ;;  %v2437_v32 = vld [vmem:[%s3022_s0 + $0x10] sm:$0xff] }
   0xc   : > { %s2376_s11 = sshll.u32 %s3033_s10, 7  ;;  %v2408_v25 = vld [vmem:[%s3022_s0 + $0x20] sm:$0xff]  ;;  %v2420_v27 = vld [vmem:[%s3022_s0 + $0x28] sm:$0xff]  ;;  %v2442_v33 = vld [vmem:[%s3022_s0 + $0x30] sm:$0xff]  ;;  %s2557_s19 = sshll.u32 %s3033_s10, 1 }
   0xd   : > { %s2382_s14 = scalar_lea.vmem %s3023_s1, %s2376_s11  ;;  %s2426_s25 = scalar_lea.vmem %s3024_s2, %s2376_s11  ;;  %v2450_v35 = vld [vmem:[%s3022_s0 + $0x18] sm:$0xff] }
   0xe   : > { %v547_v0 = vld [vmem:[%s2382_s14 + $0x70] sm:$0xff]  ;;  %v548_v1 = vld [vmem:[%s2382_s14 + $0x78] sm:$0xff]  ;;  %v545_v2 = vld [vmem:[%s2382_s14 + $0x60] sm:$0xff]  ;;  %s2523_s18 = scalar_lea.vmem %s3025_s3, %s2376_s11  ;;  %s2563_s22 = scalar_lea.vmem %s3026_s4, %s2557_s19 }
   0xf   : > { %v556_v3 = vpack.c.bf16 %v548_v1, %v547_v0  ;;  %v546_v4 = vld [vmem:[%s2382_s14 + $0x68] sm:$0xff]  ;;  %v543_v6 = vld [vmem:[%s2382_s14 + $0x50] sm:$0xff]  ;;  %v544_v7 = vld [vmem:[%s2382_s14 + $0x58] sm:$0xff]  ;;  %s2570_s10 = scalar_lea.vmem %s3027_s5, %s2557_s19  ;;  %s2699_s28 = scalar_lea.vmem %s3028_s6, %s2557_s19 }
  0x10   : > { %v555_v5 = vpack.c.bf16 %v546_v4, %v545_v2  ;;  %v554_v8 = vpack.c.bf16 %v544_v7, %v543_v6  ;;  %v541_v9 = vld [vmem:[%s2382_s14 + $0x40] sm:$0xff]  ;;  %v542_v10 = vld [vmem:[%s2382_s14 + $0x48] sm:$0xff]  ;;  %v539_v12 = vld [vmem:[%s2382_s14 + $0x30] sm:$0xff]  ;;  %s2706_s13 = scalar_lea.vmem %s3029_s7, %s2557_s19  ;;  %s2744_s16 = scalar_lea.vmem %s3031_s9, %s2557_s19 }
  0x11   : > { %605 = vmatpush.bf16.msra.mxu0 %v556_v3  ;;  %2275 = vmatpush.bf16.msra.mxu2 %v556_v3  ;;  %v553_v11 = vpack.c.bf16 %v542_v10, %v541_v9  ;;  %v540_v13 = vld [vmem:[%s2382_s14 + $0x38] sm:$0xff]  ;;  %v537_v15 = vld [vmem:[%s2382_s14 + $0x20] sm:$0xff]  ;;  %v538_v16 = vld [vmem:[%s2382_s14 + $0x28] sm:$0xff] }
  0x12   : > { %v552_v14 = vpack.c.bf16 %v540_v13, %v539_v12  ;;  %v551_v17 = vpack.c.bf16 %v538_v16, %v537_v15  ;;  %v535_v18 = vld [vmem:[%s2382_s14 + $0x10] sm:$0xff]  ;;  %v536_v19 = vld [vmem:[%s2382_s14 + $0x18] sm:$0xff]  ;;  %v533_v21 = vld [vmem:[%s2382_s14] sm:$0xff] }
  0x13   : > { %v550_v20 = vpack.c.bf16 %v536_v19, %v535_v18  ;;  %v534_v22 = vld [vmem:[%s2382_s14 + $0x8] sm:$0xff]  ;;  %v2250_v28 = vld [vmem:[%s2426_s25 + $0x38] sm:$0xff]  ;;  %v2249_v29 = vld [vmem:[%s2426_s25 + $0x30] sm:$0xff] }
  0x14   : > { %v549_v23 = vpack.c.bf16 %v534_v22, %v533_v21  ;;  %726 = vmatpush.bf16.msra.mxu1 %v2250_v28  ;;  %2283 = vmatpush.bf16.msra.mxu3 %v2250_v28  ;;  %v2248_v30 = vld [vmem:[%s2426_s25 + $0x28] sm:$0xff]  ;;  %v2247_v31 = vld [vmem:[%s2426_s25 + $0x20] sm:$0xff]  ;;  %v2246_v34 = vld [vmem:[%s2426_s25 + $0x18] sm:$0xff] }
  0x15   : > { %606 = vmatpush.bf16.msra.mxu0 %v555_v5  ;;  %2276 = vmatpush.bf16.msra.mxu2 %v555_v5  ;;  %v2455_v36 = vld [vmem:[%s3022_s0 + $0x38] sm:$0xff]  ;;  %v2245_v37 = vld [vmem:[%s2426_s25 + $0x10] sm:$0xff]  ;;  %v2244_v38 = vld [vmem:[%s2426_s25 + $0x8] sm:$0xff] }
  0x16   : > { %v2243_v39 = vld [vmem:[%s2426_s25] sm:$0xff] }
  0x18   : > { %727 = vmatpush.bf16.msra.mxu1 %v2249_v29  ;;  %2284 = vmatpush.bf16.msra.mxu3 %v2249_v29 }
  0x19   : > { %607 = vmatpush.bf16.msra.mxu0 %v554_v8  ;;  %2277 = vmatpush.bf16.msra.mxu2 %v554_v8 }
  0x1c   : > { %728 = vmatpush.bf16.msra.mxu1 %v2248_v30  ;;  %2285 = vmatpush.bf16.msra.mxu3 %v2248_v30 }
  0x1d   : > { %608 = vmatpush.bf16.msra.mxu0 %v553_v11  ;;  %2278 = vmatpush.bf16.msra.mxu2 %v553_v11 }
  0x20   : > { %729 = vmatpush.bf16.msra.mxu1 %v2247_v31  ;;  %2286 = vmatpush.bf16.msra.mxu3 %v2247_v31 }
  0x21   : > { %609 = vmatpush.bf16.msra.mxu0 %v552_v14  ;;  %2279 = vmatpush.bf16.msra.mxu2 %v552_v14 }
  0x24   : > { %730 = vmatpush.bf16.msra.mxu1 %v2246_v34  ;;  %2287 = vmatpush.bf16.msra.mxu3 %v2246_v34 }
  0x25   : > { %610 = vmatpush.bf16.msra.mxu0 %v551_v17  ;;  %2280 = vmatpush.bf16.msra.mxu2 %v551_v17 }
  0x28   : > { %731 = vmatpush.bf16.msra.mxu1 %v2245_v37  ;;  %2288 = vmatpush.bf16.msra.mxu3 %v2245_v37 }
  0x29   : > { %611 = vmatpush.bf16.msra.mxu0 %v550_v20  ;;  %2281 = vmatpush.bf16.msra.mxu2 %v550_v20 }
  0x2c   : > { %732 = vmatpush.bf16.msra.mxu1 %v2244_v38  ;;  %2289 = vmatpush.bf16.msra.mxu3 %v2244_v38 }
  0x2d   : > { %612 = vmatpush.bf16.msra.mxu0 %v549_v23  ;;  %2282 = vmatpush.bf16.msra.mxu2 %v549_v23 }
  0x30   : > { %613 = vmatmul.bf16.vlgmr.msra.gmra.mxu0 %v2403_v24  ;;  %633 = vmatmul.bf16.vlgmr.msra.gmra.mxu2 %v2408_v25 }
  0x31   : > { %733 = vmatpush.bf16.msra.mxu1 %v2243_v39  ;;  %2290 = vmatpush.bf16.msra.mxu3 %v2243_v39 }
  0x40   : > { %618 = vmatmul.bf16.gmra.mxu0 %v2415_v26  ;;  %638 = vmatmul.bf16.gmra.mxu2 %v2420_v27 }
  0x50   : > { %623 = vmatmul.bf16.gmra.mxu0 %v2437_v32  ;;  %643 = vmatmul.bf16.gmra.mxu2 %v2442_v33 }
  0x60   : > { %628 = vmatmul.bf16.gmra.mxu0 %v2450_v35  ;;  %648 = vmatmul.bf16.gmra.mxu2 %v2455_v36 }
  0xad   : > { %v614_v40 = vpop.f32.mrf.mxu0 }
  0xb3   : > { %v634_v41 = vpop.f32.mrf.mxu2 }
  0xb5   : > { %v616_v42 = vpop.f32.mrf.mxu0 }
  0xb6   : > { %v654_v43 = vpack.c.bf16 %v616_v42, %v614_v40 }
  0xb8   : > { %734 = vmatmul.bf16.vlgmr.msra.gmra.mxu1 %v654_v43 }
  0xbb   : > { %v636_v44 = vpop.f32.mrf.mxu2 }
  0xbc   : > { %v658_v45 = vpack.c.bf16 %v636_v44, %v634_v41 }
  0xbd   : > { %v619_v46 = vpop.f32.mrf.mxu0 }
  0xbe   : > { %754 = vmatmul.bf16.vlgmr.msra.gmra.mxu3 %v658_v45 }
  0xc3   : > { %v639_v47 = vpop.f32.mrf.mxu2 }
  0xc5   : > { %v621_v48 = vpop.f32.mrf.mxu0 }
  0xc6   : > { %v655_v49 = vpack.c.bf16 %v621_v48, %v619_v46 }
  0xc8   : > { %739 = vmatmul.bf16.gmra.mxu1 %v655_v49 }
  0xcb   : > { %v641_v50 = vpop.f32.mrf.mxu2 }
  0xcc   : > { %v659_v51 = vpack.c.bf16 %v641_v50, %v639_v47 }
  0xcd   : > { %v624_v52 = vpop.f32.mrf.mxu0 }
  0xce   : > { %759 = vmatmul.bf16.gmra.mxu3 %v659_v51 }
  0xd3   : > { %v644_v53 = vpop.f32.mrf.mxu2 }
  0xd5   : > { %v626_v54 = vpop.f32.mrf.mxu0 }
  0xd6   : > { %v656_v55 = vpack.c.bf16 %v626_v54, %v624_v52 }
  0xd8   : > { %744 = vmatmul.bf16.gmra.mxu1 %v656_v55 }
  0xdb   : > { %v646_v56 = vpop.f32.mrf.mxu2 }
  0xdc   : > { %v660_v57 = vpack.c.bf16 %v646_v56, %v644_v53  ;;  %v2258_v53 = vld [vmem:[%s2523_s18 + $0x38] sm:$0xff] }
  0xdd   : > { %v629_v58 = vpop.f32.mrf.mxu0  ;;  %996 = vmatpush.bf16.msrb.mxu2 %v2258_v53 }
  0xde   : > { %764 = vmatmul.bf16.gmra.mxu3 %v660_v57 }
  0xe3   : > { %v649_v59 = vpop.f32.mrf.mxu2 }
  0xe5   : > { %v631_v60 = vpop.f32.mrf.mxu0 }
  0xe6   : > { %v657_v61 = vpack.c.bf16 %v631_v60, %v629_v58  ;;  %v2257_v60 = vld [vmem:[%s2523_s18 + $0x30] sm:$0xff] }
  0xe7   : > { %997 = vmatpush.bf16.msrb.mxu2 %v2257_v60  ;;  %v775_v60 = vld [vmem:[%s2563_s22] sm:$0x1] }
  0xe8   : > { %749 = vmatmul.bf16.gmra.mxu1 %v657_v61 }
  0xeb   : > { %v651_v62 = vpop.f32.mrf.mxu2 }
  0xec   : > { %v661_v63 = vpack.c.bf16 %v651_v62, %v649_v59 }
  0xee   : > { %769 = vmatmul.bf16.gmra.mxu3 %v661_v63 }
 0x135   : > { %v2462_v0 = vpop.f32.mrf.mxu1 }
 0x136   : > { %v799_v12 = vmul.f32 %v2462_v0, %v2462_v0 }
 0x13d   : > { %v2464_v1 = vpop.f32.mrf.mxu1 }
 0x13e   : > { %v800_v10 = vmul.f32 %v2464_v1, %v2464_v1  ;;  %v777_v13 = vadd.f32 %v2464_v1, %v2462_v0 }
 0x140   : > { %v815_v15 = vadd.f32 %v800_v10, %v799_v12 }
 0x141   : > { %v2466_v2 = vpop.f32.mrf.mxu3 }
 0x142   : > { %v807_v43 = vmul.f32 %v2466_v2, %v2466_v2 }
 0x145   : > { %v2468_v3 = vpop.f32.mrf.mxu1 }
 0x146   : > { %v801_v14 = vmul.f32 %v2468_v3, %v2468_v3  ;;  %v778_v16 = vadd.f32 %v777_v13, %v2468_v3 }
 0x148   : > { %v816_v19 = vadd.f32 %v815_v15, %v801_v14  ;;  %v2256_v15 = vld [vmem:[%s2523_s18 + $0x28] sm:$0xff] }
 0x149   : > { %v2470_v4 = vpop.f32.mrf.mxu3  ;;  %998 = vmatpush.bf16.msrb.mxu2 %v2256_v15 }
 0x14a   : > { %v808_v47 = vmul.f32 %v2470_v4, %v2470_v4 }
 0x14d   : > { %v2472_v5 = vpop.f32.mrf.mxu1 }
 0x14e   : > { %v802_v17 = vmul.f32 %v2472_v5, %v2472_v5  ;;  %v779_v20 = vadd.f32 %v778_v16, %v2472_v5 }
 0x150   : > { %v817_v22 = vadd.f32 %v816_v19, %v802_v17 }
 0x151   : > { %v2474_v6 = vpop.f32.mrf.mxu3 }
 0x152   : > { %v809_v50 = vmul.f32 %v2474_v6, %v2474_v6 }
 0x155   : > { %v2476_v7 = vpop.f32.mrf.mxu1 }
 0x156   : > { %v803_v21 = vmul.f32 %v2476_v7, %v2476_v7  ;;  %v780_v23 = vadd.f32 %v779_v20, %v2476_v7 }
 0x158   : > { %v818_v30 = vadd.f32 %v817_v22, %v803_v21  ;;  %v2255_v22 = vld [vmem:[%s2523_s18 + $0x20] sm:$0xff] }
 0x159   : > { %v2478_v8 = vpop.f32.mrf.mxu3  ;;  %999 = vmatpush.bf16.msrb.mxu2 %v2255_v22 }
 0x15a   : > { %v810_v54 = vmul.f32 %v2478_v8, %v2478_v8 }
 0x15d   : > { %v2480_v9 = vpop.f32.mrf.mxu1 }
 0x15e   : > { %v804_v28 = vmul.f32 %v2480_v9, %v2480_v9  ;;  %v781_v31 = vadd.f32 %v780_v23, %v2480_v9 }
 0x160   : > { %v819_v37 = vadd.f32 %v818_v30, %v804_v28 }
 0x161   : > { %v2484_v11 = vpop.f32.mrf.mxu3 }
 0x162   : > { %v811_v57 = vmul.f32 %v2484_v11, %v2484_v11 }
 0x165   : > { %v2495_v18 = vpop.f32.mrf.mxu1 }
 0x166   : > { %v805_v34 = vmul.f32 %v2495_v18, %v2495_v18  ;;  %v782_v38 = vadd.f32 %v781_v31, %v2495_v18 }
 0x168   : > { %v820_v40 = vadd.f32 %v819_v37, %v805_v34  ;;  %v2254_v34 = vld [vmem:[%s2523_s18 + $0x18] sm:$0xff] }
 0x169   : > { %v2503_v29 = vpop.f32.mrf.mxu3  ;;  %1000 = vmatpush.bf16.msrb.mxu2 %v2254_v34 }
 0x16a   : > { %v812_v61 = vmul.f32 %v2503_v29, %v2503_v29 }
 0x16d   : > { %v2509_v39 = vpop.f32.mrf.mxu1 }
 0x16e   : > { %v783_v41 = vadd.f32 %v782_v38, %v2509_v39  ;;  %v806_v42 = vmul.f32 %v2509_v39, %v2509_v39 }
 0x170   : > { %v784_v44 = vadd.f32 %v783_v41, %v2466_v2  ;;  %v821_v45 = vadd.f32 %v820_v40, %v806_v42  ;;  %v2253_v42 = vld [vmem:[%s2523_s18 + $0x10] sm:$0xff] }
 0x171   : > { %v2517_v46 = vpop.f32.mrf.mxu3  ;;  %1001 = vmatpush.bf16.msrb.mxu2 %v2253_v42 }
 0x172   : > { %v785_v48 = vadd.f32 %v784_v44, %v2470_v4  ;;  %v822_v49 = vadd.f32 %v821_v45, %v807_v43  ;;  %v813_v13 = vmul.f32 %v2517_v46, %v2517_v46 }
 0x174   : > { %v786_v51 = vadd.f32 %v785_v48, %v2474_v6  ;;  %v823_v52 = vadd.f32 %v822_v49, %v808_v47  ;;  %v2252_v48 = vld [vmem:[%s2523_s18 + $0x8] sm:$0xff] }
 0x175   : > { %1002 = vmatpush.bf16.msrb.mxu2 %v2252_v48 }
 0x176   : > { %v824_v55 = vadd.f32 %v823_v52, %v809_v50  ;;  %v787_v56 = vadd.f32 %v786_v51, %v2478_v8  ;;  %v2251_v51 = vld [vmem:[%s2523_s18] sm:$0xff] }
 0x178   : > { %v788_v58 = vadd.f32 %v787_v56, %v2484_v11  ;;  %v825_v59 = vadd.f32 %v824_v55, %v810_v54 }
 0x179   : > { %v2542_v10 = vpop.f32.mrf.mxu3  ;;  %1003 = vmatpush.bf16.msrb.mxu2 %v2251_v51 }
 0x17a   : > { %v789_v62 = vadd.f32 %v788_v58, %v2503_v29  ;;  %v826_v63 = vadd.f32 %v825_v59, %v811_v57  ;;  %v814_v19 = vmul.f32 %v2542_v10, %v2542_v10 }
 0x17c   : > { %v790_v12 = vadd.f32 %v789_v62, %v2517_v46  ;;  %v827_v14 = vadd.f32 %v826_v63, %v812_v61 }
 0x17e   : > { %v828_v16 = vadd.f32 %v827_v14, %v813_v13  ;;  %v791_v17 = vadd.f32 %v790_v12, %v2542_v10  ;;  %v776_v12 = vld [vmem:[%s2570_s10] sm:$0x1] }
 0x180   : > { %v792_v20 = vrot.slane %v791_v17, 4  ;;  %v829_v21 = vadd.f32 %v828_v16, %v814_v19 }
 0x182   : > { %v793_v23 = vadd.f32 %v792_v20, %v791_v17  ;;  %v830_v28 = vrot.slane %v829_v21, 4 }
 0x184   : > { %v794_v30 = vrot.slane %v793_v23, 2  ;;  %v831_v31 = vadd.f32 %v830_v28, %v829_v21 }
 0x186   : > { %v795_v37 = vadd.f32 %v794_v30, %v793_v23  ;;  %v832_v38 = vrot.slane %v831_v31, 2 }
 0x188   : > { %v796_v40 = vrot.slane %v795_v37, 1  ;;  %v833_v41 = vadd.f32 %v832_v38, %v831_v31 }
 0x18a   : > { %v797_v43 = vadd.f32 %v796_v40, %v795_v37  ;;  %v834_v44 = vrot.slane %v833_v41, 1 }
 0x18c   : > { %v798_v45 = vmul.f32 0.0625, %v797_v43  ;;  %v835_v47 = vadd.f32 %v834_v44, %v833_v41 }
 0x18e   : > { %v836_v49 = vmul.f32 0.0625, %v835_v47  ;;  %v837_v50 = vmul.f32 %v798_v45, %v798_v45 }
 0x190   : > { %v838_v52 = vsub.f32 %v836_v49, %v837_v50 }
 0x192   : > { %v839_v53 = vmax.f32 %v838_v52, 0.0 }
 0x194   : > { %v840_v54 = vadd.f32 1e-05, %v839_v53 }
 0x196   : > { %2299 = vrsqrt.f32 %v840_v54  ;;  %vm847_vm1 = vweird.f32 %v840_v54 }
 0x19c   : > { %v2300_v55 = vpop.eup %2299 }
 0x19d   : > { %v842_v56 = vmul.f32 %v2300_v55, %v840_v54  ;;  %vm848_vm0 = vweird.f32 %v2300_v55 }
 0x19e   : > { %vm849_vm2 = vmor %vm847_vm1, %vm848_vm0 }
 0x19f   : > { %v843_v57 = vmul.f32 %v2300_v55, %v842_v56 }
 0x1a1   : > { %v844_v58 = vmul.f32 0.5, %v843_v57 }
 0x1a3   : > { %v845_v59 = vsub.f32 1.5, %v844_v58 }
 0x1a5   : > { %v846_v61 = vmul.f32 %v2300_v55, %v845_v59 }
 0x1a7   : > { %v850_v62 = vsel %vm849_vm2, %v2300_v55, %v846_v61 }
 0x1a8   : > { %v851_v63 = vmul.f32 %v850_v62, %v775_v60 }
 0x1aa   : > { %v852_v13 = vmul.f32 %v851_v63, %v798_v45  ;;  %v2573_v14 = vperm.slane %v851_v63, 0 }
 0x1ac   : > { %v853_v15 = vsub.f32 %v776_v12, %v852_v13  ;;  %v857_v17 = vmul.f32 %v2573_v14, %v2462_v0  ;;  %v858_v19 = vmul.f32 %v2573_v14, %v2464_v1  ;;  %v867_v30 = vmul.f32 %v2573_v14, %v2474_v6 }
 0x1ad   : > { %v868_v31 = vmul.f32 %v2573_v14, %v2478_v8  ;;  %v859_v0 = vmul.f32 %v2573_v14, %v2468_v3  ;;  %v860_v1 = vmul.f32 %v2573_v14, %v2472_v5  ;;  %v869_v37 = vmul.f32 %v2573_v14, %v2484_v11 }
 0x1ae   : > { %v2575_v16 = vperm.slane %v853_v15, 0  ;;  %v872_v38 = vmul.f32 %v2573_v14, %v2542_v10  ;;  %v870_v8 = vmul.f32 %v2573_v14, %v2503_v29  ;;  %v871_v11 = vmul.f32 %v2573_v14, %v2517_v46 }
 0x1af   : > { %v861_v62 = vmul.f32 %v2573_v14, %v2476_v7  ;;  %v862_v63 = vmul.f32 %v2573_v14, %v2480_v9 }
 0x1b0   : > { %v876_v20 = vadd.f32 %v2575_v16, %v857_v17  ;;  %v877_v21 = vadd.f32 %v2575_v16, %v858_v19  ;;  %v886_v34 = vadd.f32 %v2575_v16, %v867_v30  ;;  %v887_v6 = vadd.f32 %v2575_v16, %v868_v31 }
 0x1b1   : > { %v878_v40 = vadd.f32 %v2575_v16, %v859_v0  ;;  %v879_v3 = vadd.f32 %v2575_v16, %v860_v1  ;;  %v888_v5 = vadd.f32 %v2575_v16, %v869_v37  ;;  %v889_v43 = vadd.f32 %v2575_v16, %v870_v8 }
 0x1b2   : > { %v892_v22 = vmax.f32 %v876_v20, 0.0  ;;  %v893_v23 = vmax.f32 %v877_v21, 0.0  ;;  %v902_v41 = vmax.f32 %v886_v34, 0.0  ;;  %v903_v42 = vmax.f32 %v887_v6, 0.0 }
 0x1b3   : > { %v891_v10 = vadd.f32 %v2575_v16, %v872_v38  ;;  %v904_v45 = vmax.f32 %v888_v5, 0.0  ;;  %v905_v48 = vmax.f32 %v889_v43, 0.0  ;;  %v890_v29 = vadd.f32 %v2575_v16, %v871_v11 }
 0x1b4   : > { %v924_v28 = vpack.c.bf16 %v893_v23, %v892_v22  ;;  %v918_v44 = vmul.f32 0.0, %v902_v41  ;;  %v919_v47 = vmul.f32 0.0, %v903_v42  ;;  %v894_v50 = vmax.f32 %v878_v40, 0.0 }
 0x1b5   : > { %v907_v49 = vmax.f32 %v891_v10, 0.0  ;;  %v895_v51 = vmax.f32 %v879_v3, 0.0  ;;  %v920_v52 = vmul.f32 0.0, %v904_v45  ;;  %v921_v54 = vmul.f32 0.0, %v905_v48 }
 0x1b6   : > { %1004 = vmatmul.bf16.vlgmr.msrb.gmra.mxu2 %v924_v28  ;;  %v929_v53 = vpack.c.bf16 %v919_v47, %v918_v44  ;;  %v906_v55 = vmax.f32 %v890_v29, 0.0  ;;  %v910_v59 = vmul.f32 0.0, %v894_v50  ;;  %v880_v12 = vadd.f32 %v2575_v16, %v861_v62 }
 0x1b7   : > { %v923_v56 = vmul.f32 0.0, %v907_v49  ;;  %v930_v57 = vpack.c.bf16 %v921_v54, %v920_v52  ;;  %v911_v46 = vmul.f32 0.0, %v895_v51  ;;  %v881_v13 = vadd.f32 %v2575_v16, %v862_v63 }
 0x1b8   : > { %v922_v58 = vmul.f32 0.0, %v906_v55  ;;  %v896_v15 = vmax.f32 %v880_v12, 0.0  ;;  %v863_v22 = vmul.f32 %v2573_v14, %v2495_v18  ;;  %v864_v23 = vmul.f32 %v2573_v14, %v2509_v39 }
 0x1b9   : > { %v925_v61 = vpack.c.bf16 %v911_v46, %v910_v59  ;;  %v897_v17 = vmax.f32 %v881_v13, 0.0  ;;  %v865_v34 = vmul.f32 %v2573_v14, %v2466_v2  ;;  %v866_v37 = vmul.f32 %v2573_v14, %v2470_v4 }
 0x1ba   : > { %v931_v60 = vpack.c.bf16 %v923_v56, %v922_v58  ;;  %v912_v19 = vmul.f32 0.0, %v896_v15  ;;  %v882_v7 = vadd.f32 %v2575_v16, %v863_v22  ;;  %v883_v9 = vadd.f32 %v2575_v16, %v864_v23 }
 0x1bb   : > { %v913_v20 = vmul.f32 0.0, %v897_v17  ;;  %v884_v18 = vadd.f32 %v2575_v16, %v865_v34  ;;  %v885_v39 = vadd.f32 %v2575_v16, %v866_v37 }
 0x1bc   : > { %v898_v28 = vmax.f32 %v882_v7, 0.0  ;;  %v899_v30 = vmax.f32 %v883_v9, 0.0 }
 0x1bd   : > { %v926_v21 = vpack.c.bf16 %v913_v20, %v912_v19  ;;  %v900_v38 = vmax.f32 %v884_v18, 0.0  ;;  %v901_v6 = vmax.f32 %v885_v39, 0.0 }
 0x1be   : > { %v914_v31 = vmul.f32 0.0, %v898_v28  ;;  %v915_v0 = vmul.f32 0.0, %v899_v30 }
 0x1bf   : > { %v916_v8 = vmul.f32 0.0, %v900_v38  ;;  %v917_v40 = vmul.f32 0.0, %v901_v6 }
 0x1c0   : > { %v927_v1 = vpack.c.bf16 %v915_v0, %v914_v31 }
 0x1c1   : > { %v928_v3 = vpack.c.bf16 %v917_v40, %v916_v8 }
 0x1c6   : > { %1009 = vmatmul.bf16.gmra.mxu2 %v925_v61 }
 0x1d6   : > { %1014 = vmatmul.bf16.gmra.mxu2 %v926_v21 }
 0x1e6   : > { %1019 = vmatmul.bf16.gmra.mxu2 %v927_v1 }
 0x1f6   : > { %1024 = vmatmul.bf16.gmra.mxu2 %v928_v3 }
 0x206   : > { %1029 = vmatmul.bf16.gmra.mxu2 %v929_v53 }
 0x216   : > { %1034 = vmatmul.bf16.gmra.mxu2 %v930_v57 }
 0x226   : > { %1039 = vmatmul.bf16.gmra.mxu2 %v931_v60 }
 0x239   : > { %v2625_v41 = vpop.f32.mrf.mxu2 }
 0x23a   : > { %v1069_v48 = vmul.f32 %v2625_v41, %v2625_v41 }
 0x241   : > { %v2627_v5 = vpop.f32.mrf.mxu2 }
 0x242   : > { %v1070_v47 = vmul.f32 %v2627_v5, %v2627_v5  ;;  %v1047_v29 = vadd.f32 %v2627_v5, %v2625_v41 }
 0x244   : > { %v1085_v50 = vadd.f32 %v1070_v47, %v1069_v48 }
 0x249   : > { %v2629_v2 = vpop.f32.mrf.mxu2 }
 0x24a   : > { %v1071_v49 = vmul.f32 %v2629_v2, %v2629_v2  ;;  %v1048_v51 = vadd.f32 %v1047_v29, %v2629_v2 }
 0x24c   : > { %v1086_v54 = vadd.f32 %v1085_v50, %v1071_v49 }
 0x251   : > { %v2631_v4 = vpop.f32.mrf.mxu2 }
 0x252   : > { %v1072_v52 = vmul.f32 %v2631_v4, %v2631_v4  ;;  %v1049_v55 = vadd.f32 %v1048_v51, %v2631_v4 }
 0x254   : > { %v1087_v57 = vadd.f32 %v1086_v54, %v1072_v52 }
 0x259   : > { %v2633_v14 = vpop.f32.mrf.mxu2 }
 0x25a   : > { %v1073_v56 = vmul.f32 %v2633_v14, %v2633_v14  ;;  %v1050_v58 = vadd.f32 %v1049_v55, %v2633_v14 }
 0x25c   : > { %v1088_v46 = vadd.f32 %v1087_v57, %v1073_v56 }
 0x261   : > { %v2635_v16 = vpop.f32.mrf.mxu2 }
 0x262   : > { %v1074_v59 = vmul.f32 %v2635_v16, %v2635_v16  ;;  %v1051_v60 = vadd.f32 %v1050_v58, %v2635_v16 }
 0x264   : > { %v1089_v62 = vadd.f32 %v1088_v46, %v1074_v59 }
 0x269   : > { %v2637_v42 = vpop.f32.mrf.mxu2 }
 0x26a   : > { %v1075_v61 = vmul.f32 %v2637_v42, %v2637_v42  ;;  %v1052_v63 = vadd.f32 %v1051_v60, %v2637_v42 }
 0x26c   : > { %v1090_v15 = vadd.f32 %v1089_v62, %v1075_v61 }
 0x271   : > { %v2639_v43 = vpop.f32.mrf.mxu2 }
 0x272   : > { %v1076_v12 = vmul.f32 %v2639_v43, %v2639_v43  ;;  %v1053_v17 = vadd.f32 %v1052_v63, %v2639_v43 }
 0x274   : > { %v1091_v20 = vadd.f32 %v1090_v15, %v1076_v12 }
 0x279   : > { %v2641_v11 = vpop.f32.mrf.mxu2 }
 0x27a   : > { %v1077_v19 = vmul.f32 %v2641_v11, %v2641_v11  ;;  %v1054_v21 = vadd.f32 %v1053_v17, %v2641_v11 }
 0x27c   : > { %v1092_v23 = vadd.f32 %v1091_v20, %v1077_v19 }
 0x281   : > { %v2643_v10 = vpop.f32.mrf.mxu2 }
 0x282   : > { %v1078_v22 = vmul.f32 %v2643_v10, %v2643_v10  ;;  %v1055_v7 = vadd.f32 %v1054_v21, %v2643_v10 }
 0x284   : > { %v1093_v28 = vadd.f32 %v1092_v23, %v1078_v22 }
 0x289   : > { %v2645_v44 = vpop.f32.mrf.mxu2 }
 0x28a   : > { %v1079_v9 = vmul.f32 %v2645_v44, %v2645_v44  ;;  %v1056_v30 = vadd.f32 %v1055_v7, %v2645_v44 }
 0x28c   : > { %v1094_v1 = vadd.f32 %v1093_v28, %v1079_v9 }
 0x291   : > { %v2647_v45 = vpop.f32.mrf.mxu2 }
 0x292   : > { %v1080_v31 = vmul.f32 %v2647_v45, %v2647_v45  ;;  %v1057_v34 = vadd.f32 %v1056_v30, %v2647_v45  ;;  %v1045_v30 = vld [vmem:[%s2699_s28] sm:$0x1] }
 0x294   : > { %v1095_v18 = vadd.f32 %v1094_v1, %v1080_v31 }
 0x299   : > { %v2660_v53 = vpop.f32.mrf.mxu2 }
 0x29a   : > { %v1081_v37 = vmul.f32 %v2660_v53, %v2660_v53  ;;  %v1058_v39 = vadd.f32 %v1057_v34, %v2660_v53 }
 0x29c   : > { %v1096_v6 = vadd.f32 %v1095_v18, %v1081_v37  ;;  %v1046_v37 = vld [vmem:[%s2706_s13] sm:$0x1] }
 0x2a1   : > { %v2674_v13 = vpop.f32.mrf.mxu2 }
 0x2a2   : > { %v1082_v38 = vmul.f32 %v2674_v13, %v2674_v13  ;;  %v1059_v8 = vadd.f32 %v1058_v39, %v2674_v13 }
 0x2a4   : > { %v1097_v3 = vadd.f32 %v1096_v6, %v1082_v38 }
 0x2a9   : > { %v1040_v0 = vpop.f32.mrf.mxu2 }
 0x2aa   : > { %v1083_v40 = vmul.f32 %v1040_v0, %v1040_v0  ;;  %v1060_v47 = vadd.f32 %v1059_v8, %v1040_v0 }
 0x2ac   : > { %v1098_v29 = vadd.f32 %v1097_v3, %v1083_v40 }
 0x2b1   : > { %v1042_v48 = vpop.f32.mrf.mxu2 }
 0x2b2   : > { %v1061_v49 = vadd.f32 %v1060_v47, %v1042_v48  ;;  %v1084_v50 = vmul.f32 %v1042_v48, %v1042_v48 }
 0x2b4   : > { %v1062_v51 = vrot.slane %v1061_v49, 4  ;;  %v1099_v52 = vadd.f32 %v1098_v29, %v1084_v50 }
 0x2b6   : > { %v1063_v54 = vadd.f32 %v1062_v51, %v1061_v49  ;;  %v1100_v55 = vrot.slane %v1099_v52, 4 }
 0x2b8   : > { %v1064_v56 = vrot.slane %v1063_v54, 2  ;;  %v1101_v57 = vadd.f32 %v1100_v55, %v1099_v52 }
 0x2ba   : > { %v1065_v58 = vadd.f32 %v1064_v56, %v1063_v54  ;;  %v1102_v59 = vrot.slane %v1101_v57, 2 }
 0x2bc   : > { %v1066_v46 = vrot.slane %v1065_v58, 1  ;;  %v1103_v60 = vadd.f32 %v1102_v59, %v1101_v57 }
 0x2be   : > { %v1067_v61 = vadd.f32 %v1066_v46, %v1065_v58  ;;  %v1104_v62 = vrot.slane %v1103_v60, 1 }
 0x2c0   : > { %v1068_v63 = vmul.f32 0.0625, %v1067_v61  ;;  %v1105_v12 = vadd.f32 %v1104_v62, %v1103_v60 }
 0x2c2   : > { %v1106_v15 = vmul.f32 0.0625, %v1105_v12  ;;  %v1107_v17 = vmul.f32 %v1068_v63, %v1068_v63 }
 0x2c4   : > { %v1108_v19 = vsub.f32 %v1106_v15, %v1107_v17 }
 0x2c6   : > { %v1109_v20 = vmax.f32 %v1108_v19, 0.0 }
 0x2c8   : > { %v1110_v21 = vadd.f32 1e-05, %v1109_v20 }
 0x2ca   : > { %2301 = vrsqrt.f32 %v1110_v21  ;;  %vm1117_vm4 = vweird.f32 %v1110_v21 }
 0x2d0   : > { %v2302_v22 = vpop.eup %2301 }
 0x2d1   : > { %v1112_v23 = vmul.f32 %v2302_v22, %v1110_v21  ;;  %vm1118_vm3 = vweird.f32 %v2302_v22 }
 0x2d2   : > { %vm1119_vm5 = vmor %vm1117_vm4, %vm1118_vm3 }
 0x2d3   : > { %v1113_v7 = vmul.f32 %v2302_v22, %v1112_v23 }
 0x2d5   : > { %v1114_v9 = vmul.f32 0.5, %v1113_v7 }
 0x2d7   : > { %v1115_v28 = vsub.f32 1.5, %v1114_v9 }
 0x2d9   : > { %v1116_v31 = vmul.f32 %v2302_v22, %v1115_v28 }
 0x2db   : > { %v1120_v1 = vsel %vm1119_vm5, %v2302_v22, %v1116_v31 }
 0x2dc   : > { %v1121_v34 = vmul.f32 %v1120_v1, %v1045_v30 }
 0x2de   : > { %v1122_v18 = vmul.f32 %v1121_v34, %v1068_v63  ;;  %v1125_v39 = vperm.slane %v1121_v34, 0 }
 0x2e0   : > { %v1123_v38 = vsub.f32 %v1046_v37, %v1122_v18  ;;  %v1142_v6 = vmul.f32 %v1125_v39, %v1042_v48  ;;  %v1141_v40 = vmul.f32 %v1125_v39, %v1040_v0  ;;  %v1139_v3 = vmul.f32 %v1125_v39, %v2660_v53 }
 0x2e1   : > { %v1140_v47 = vmul.f32 %v1125_v39, %v2674_v13  ;;  %v1137_v29 = vmul.f32 %v1125_v39, %v2645_v44  ;;  %v1138_v49 = vmul.f32 %v1125_v39, %v2647_v45  ;;  %v1135_v57 = vmul.f32 %v1125_v39, %v2641_v11 }
 0x2e2   : > { %v1144_v8 = vperm.slane %v1123_v38, 0  ;;  %v1136_v48 = vmul.f32 %v1125_v39, %v2643_v10  ;;  %v1133_v62 = vmul.f32 %v1125_v39, %v2637_v42  ;;  %v1129_v12 = vmul.f32 %v1125_v39, %v2629_v2 }
 0x2e3   : > { %v1134_v15 = vmul.f32 %v1125_v39, %v2639_v43  ;;  %v1131_v17 = vmul.f32 %v1125_v39, %v2633_v14  ;;  %v1132_v19 = vmul.f32 %v1125_v39, %v2635_v16  ;;  %v1130_v20 = vmul.f32 %v1125_v39, %v2631_v4 }
 0x2e4   : > { %v1161_v50 = vadd.f32 %v1144_v8, %v1142_v6  ;;  %v1160_v51 = vadd.f32 %v1144_v8, %v1141_v40  ;;  %v1158_v52 = vadd.f32 %v1144_v8, %v1139_v3  ;;  %v1159_v54 = vadd.f32 %v1144_v8, %v1140_v47 }
 0x2e5   : > { %v1156_v55 = vadd.f32 %v1144_v8, %v1137_v29  ;;  %v1157_v56 = vadd.f32 %v1144_v8, %v1138_v49  ;;  %v1154_v46 = vadd.f32 %v1144_v8, %v1135_v57  ;;  %v1155_v60 = vadd.f32 %v1144_v8, %v1136_v48 }
 0x2e6   : > { %v1176_v58 = vmax.f32 %v1160_v51, 0.0  ;;  %v1177_v0 = vmax.f32 %v1161_v50, 0.0  ;;  %v1174_v59 = vmax.f32 %v1158_v52, 0.0  ;;  %v1175_v53 = vmax.f32 %v1159_v54, 0.0 }
 0x2e7   : > { %v1172_v45 = vmax.f32 %v1156_v55, 0.0  ;;  %v1173_v61 = vmax.f32 %v1157_v56, 0.0  ;;  %v1170_v42 = vmax.f32 %v1154_v46, 0.0  ;;  %v1171_v22 = vmax.f32 %v1155_v60, 0.0 }
 0x2e8   : > { %v2715_v13 = vmul.f32 0.0, %v1176_v58  ;;  %v2717_v44 = vmul.f32 0.0, %v1177_v0  ;;  %v2722_v11 = vmul.f32 0.0, %v1174_v59  ;;  %v2724_v10 = vmul.f32 0.0, %v1175_v53 }
 0x2e9   : > { %v1188_v21 = vmul.f32 0.0, %v1172_v45  ;;  %v1148_v23 = vadd.f32 %v1144_v8, %v1129_v12  ;;  %v1189_v7 = vmul.f32 0.0, %v1173_v61  ;;  %v1149_v9 = vadd.f32 %v1144_v8, %v1130_v20 }
 0x2ea   : > { %v1223_v63 = vpack.c.bf16 %v2717_v44, %v2715_v13  ;;  %v1127_v28 = vmul.f32 %v1125_v39, %v2625_v41  ;;  %v1128_v30 = vmul.f32 %v1125_v39, %v2627_v5  ;;  %v1222_v2 = vpack.c.bf16 %v2724_v10, %v2722_v11 }
 0x2eb   : > { %v1152_v43 = vadd.f32 %v1144_v8, %v1133_v62  ;;  %v1153_v14 = vadd.f32 %v1144_v8, %v1134_v15  ;;  %v1164_v31 = vmax.f32 %v1148_v23, 0.0  ;;  %v1150_v16 = vadd.f32 %v1144_v8, %v1131_v17 }
 0x2ec   : > { %1224 = vmatpush.bf16.msrb.mxu3 %v1223_v63  ;;  %v1146_v1 = vadd.f32 %v1144_v8, %v1127_v28  ;;  %v1147_v4 = vadd.f32 %v1144_v8, %v1128_v30  ;;  %v1186_v34 = vmul.f32 0.0, %v1170_v42  ;;  %v1151_v37 = vadd.f32 %v1144_v8, %v1132_v19 }
 0x2ed   : > { %v1165_v18 = vmax.f32 %v1149_v9, 0.0  ;;  %v1180_v38 = vmul.f32 0.0, %v1164_v31  ;;  %v1221_v3 = vpack.c.bf16 %v1189_v7, %v1188_v21  ;;  %v1187_v41 = vmul.f32 0.0, %v1171_v22 }
 0x2ee   : > { %v1162_v6 = vmax.f32 %v1146_v1, 0.0  ;;  %v1163_v40 = vmax.f32 %v1147_v4, 0.0  ;;  %v1168_v47 = vmax.f32 %v1152_v43, 0.0  ;;  %v1169_v5 = vmax.f32 %v1153_v14, 0.0 }
 0x2ef   : > { %v1166_v39 = vmax.f32 %v1150_v16, 0.0  ;;  %v1167_v49 = vmax.f32 %v1151_v37, 0.0  ;;  %v1181_v50 = vmul.f32 0.0, %v1165_v18  ;;  %v1220_v52 = vpack.c.bf16 %v1187_v41, %v1186_v34 }
 0x2f0   : > { %1225 = vmatpush.bf16.msrb.mxu3 %v1222_v2  ;;  %v1194_v29 = vadd.f32 %v1163_v40, %v1162_v6  ;;  %v1184_v54 = vmul.f32 0.0, %v1168_v47  ;;  %v1185_v55 = vmul.f32 0.0, %v1169_v5  ;;  %v1216_v63 = vpack.c.bf16 %v1163_v40, %v1162_v6 }
 0x2f1   : > { %v1182_v56 = vmul.f32 0.0, %v1166_v39  ;;  %v1183_v8 = vmul.f32 0.0, %v1167_v49  ;;  %v1217_v60 = vpack.c.bf16 %v1181_v50, %v1180_v38 }
 0x2f2   : > { %v1195_v51 = vadd.f32 %v1194_v29, %v1180_v38  ;;  %v1219_v58 = vpack.c.bf16 %v1185_v55, %v1184_v54 }
 0x2f3   : > { %v1218_v53 = vpack.c.bf16 %v1183_v8, %v1182_v56 }
 0x2f4   : > { %1226 = vmatpush.bf16.msrb.mxu3 %v1221_v3  ;;  %v1196_v57 = vadd.f32 %v1195_v51, %v1181_v50 }
 0x2f6   : > { %v1197_v48 = vadd.f32 %v1196_v57, %v1182_v56 }
 0x2f8   : > { %1227 = vmatpush.bf16.msrb.mxu3 %v1220_v52  ;;  %v1198_v0 = vadd.f32 %v1197_v48, %v1183_v8 }
 0x2fa   : > { %v1199_v59 = vadd.f32 %v1198_v0, %v1184_v54 }
 0x2fc   : > { %1228 = vmatpush.bf16.msrb.mxu3 %v1219_v58  ;;  %v1200_v46 = vadd.f32 %v1199_v59, %v1185_v55 }
 0x2fe   : > { %v1201_v45 = vadd.f32 %v1200_v46, %v1186_v34 }
 0x300   : > { %1229 = vmatpush.bf16.msrb.mxu3 %v1218_v53  ;;  %v1202_v61 = vadd.f32 %v1201_v45, %v1187_v41 }
 0x302   : > { %v1203_v62 = vadd.f32 %v1202_v61, %v1188_v21 }
 0x304   : > { %1230 = vmatpush.bf16.msrb.mxu3 %v1217_v60  ;;  %v1204_v12 = vadd.f32 %v1203_v62, %v1189_v7 }
 0x306   : > { %v1205_v15 = vadd.f32 %v1204_v12, %v2722_v11  ;;  %v2264_v11 = vld [vmem:[%s2426_s25 + $0x68] sm:$0xff] }
 0x308   : > { %1231 = vmatpush.bf16.msrb.mxu3 %v1216_v63  ;;  %v1206_v17 = vadd.f32 %v1205_v15, %v2724_v10  ;;  %v2263_v10 = vld [vmem:[%s2426_s25 + $0x60] sm:$0xff] }
 0x30a   : > { %v1207_v19 = vadd.f32 %v1206_v17, %v2715_v13  ;;  %v2266_v13 = vld [vmem:[%s2426_s25 + $0x78] sm:$0xff] }
 0x30b   : > { %1232 = vmatmul.bf16.vlgmr.msrb.gmra.mxu3 %v2403_v24  ;;  %1346 = vmatpush.bf16.msrb.mxu0 %v2266_v13 }
 0x30c   : > { %v1208_v20 = vadd.f32 %v1207_v19, %v2717_v44  ;;  %v2265_v44 = vld [vmem:[%s2426_s25 + $0x70] sm:$0xff] }
 0x30e   : > { %v1209_v42 = vrot.slane %v1208_v20, 4 }
 0x30f   : > { %1347 = vmatpush.bf16.msrb.mxu0 %v2265_v44 }
 0x310   : > { %v1210_v22 = vadd.f32 %v1209_v42, %v1208_v20 }
 0x312   : > { %v1211_v23 = vrot.slane %v1210_v22, 2 }
 0x313   : > { %1348 = vmatpush.bf16.msrb.mxu0 %v2264_v11 }
 0x314   : > { %v1212_v21 = vadd.f32 %v1211_v23, %v1210_v22 }
 0x316   : > { %v1213_v7 = vrot.slane %v1212_v21, 1 }
 0x317   : > { %1349 = vmatpush.bf16.msrb.mxu0 %v2263_v10 }
 0x318   : > { %v1214_v24 = vadd.f32 %v1213_v7, %v1212_v21 }
 0x31a   : > { %1215 = vst [vmem:[%s2744_s16] sm:$0x1] %v1214_v24 }
 0x31b   : > { %1237 = vmatmul.bf16.gmra.mxu3 %v2415_v26  ;;  %v2262_v26 = vld [vmem:[%s2426_s25 + $0x58] sm:$0xff] }
 0x31c   : > { %1350 = vmatpush.bf16.msrb.mxu0 %v2262_v26 }
 0x32b   : > { %1242 = vmatmul.bf16.gmra.mxu3 %v2437_v32  ;;  %v2261_v32 = vld [vmem:[%s2426_s25 + $0x50] sm:$0xff] }
 0x32c   : > { %1351 = vmatpush.bf16.msrb.mxu0 %v2261_v32 }
 0x33b   : > { %1247 = vmatmul.bf16.gmra.mxu3 %v2450_v35  ;;  %v2260_v35 = vld [vmem:[%s2426_s25 + $0x48] sm:$0xff] }
 0x33c   : > { %1352 = vmatpush.bf16.msrb.mxu0 %v2260_v35 }
 0x34b   : > { %1252 = vmatmul.bf16.gmra.mxu3 %v2408_v25  ;;  %v2259_v25 = vld [vmem:[%s2426_s25 + $0x40] sm:$0xff] }
 0x34c   : > { %1353 = vmatpush.bf16.msrb.mxu0 %v2259_v25 }
 0x35b   : > { %1257 = vmatmul.bf16.gmra.mxu3 %v2420_v27 }
 0x36b   : > { %1262 = vmatmul.bf16.gmra.mxu3 %v2442_v33 }
 0x37b   : > { %1267 = vmatmul.bf16.gmra.mxu3 %v2455_v36 }
 0x38e   : > { %v1233_v9 = vpop.f32.mrf.mxu3 }
 0x396   : > { %v1235_v27 = vpop.f32.mrf.mxu3 }
 0x397   : > { %v1273_v28 = vpack.c.bf16 %v1235_v27, %v1233_v9 }
 0x399   : > { %1354 = vmatmul.bf16.vlgmr.msrb.gmra.mxu0 %v1273_v28 }
 0x39e   : > { %v1238_v30 = vpop.f32.mrf.mxu3 }
 0x3a6   : > { %v1240_v2 = vpop.f32.mrf.mxu3 }
 0x3a7   : > { %v1274_v43 = vpack.c.bf16 %v1240_v2, %v1238_v30 }
 0x3a9   : > { %1359 = vmatmul.bf16.gmra.mxu0 %v1274_v43 }
 0x3ae   : > { %v1243_v14 = vpop.f32.mrf.mxu3 }
 0x3b6   : > { %v1245_v31 = vpop.f32.mrf.mxu3 }
 0x3b7   : > { %v1275_v16 = vpack.c.bf16 %v1245_v31, %v1243_v14 }
 0x3b9   : > { %1364 = vmatmul.bf16.gmra.mxu0 %v1275_v16 }
 0x3be   : > { %v1248_v33 = vpop.f32.mrf.mxu3 }
 0x3c6   : > { %v1250_v1 = vpop.f32.mrf.mxu3 }
 0x3c7   : > { %v1276_v4 = vpack.c.bf16 %v1250_v1, %v1248_v33 }
 0x3c9   : > { %1369 = vmatmul.bf16.gmra.mxu0 %v1276_v4 }
 0x3ce   : > { %v1253_v34 = vpop.f32.mrf.mxu3 }
 0x3d6   : > { %v1255_v37 = vpop.f32.mrf.mxu3 }
 0x3d7   : > { %v1277_v18 = vpack.c.bf16 %v1255_v37, %v1253_v34 }
 0x3d9   : > { %1374 = vmatmul.bf16.gmra.mxu0 %v1277_v18 }
 0x3de   : > { %v1258_v36 = vpop.f32.mrf.mxu3 }
 0x3e6   : > { %v1260_v38 = vpop.f32.mrf.mxu3 }
 0x3e7   : > { %v1278_v6 = vpack.c.bf16 %v1260_v38, %v1258_v36 }
 0x3e9   : > { %1379 = vmatmul.bf16.gmra.mxu0 %v1278_v6 }
 0x3ee   : > { %v1263_v40 = vpop.f32.mrf.mxu3 }
 0x3f6   : > { %v1265_v3 = vpop.f32.mrf.mxu3 }
 0x3f7   : > { %v1279_v41 = vpack.c.bf16 %v1265_v3, %v1263_v40 }
 0x3f9   : > { %1384 = vmatmul.bf16.gmra.mxu0 %v1279_v41 }
 0x3fe   : > { %v1268_v47 = vpop.f32.mrf.mxu3 }
 0x406   : > { %v1270_v5 = vpop.f32.mrf.mxu3 }
 0x407   : > { %v1280_v39 = vpack.c.bf16 %v1270_v5, %v1268_v47 }
 0x409   : > { %1389 = vmatmul.bf16.gmra.mxu0 %v1280_v39 }
 0x416   : > { %v2762_v29 = vpop.f32.mrf.mxu0 }
 0x417   : > { %v1421_v59 = vmul.f32 %v2762_v29, %v2762_v29 }
 0x41e   : > { %v2764_v49 = vpop.f32.mrf.mxu0 }
 0x41f   : > { %v1422_v0 = vmul.f32 %v2764_v49, %v2764_v49  ;;  %v1399_v53 = vadd.f32 %v2764_v49, %v2762_v29 }
 0x421   : > { %v1437_v45 = vadd.f32 %v1422_v0, %v1421_v59  ;;  %v2274_v59 = vld [vmem:[%s2523_s18 + $0x78] sm:$0xff] }
 0x422   : > { %1619 = vmatpush.bf16.msrb.mxu1 %v2274_v59 }
 0x426   : > { %v2766_v50 = vpop.f32.mrf.mxu0 }
 0x427   : > { %v1423_v46 = vmul.f32 %v2766_v50, %v2766_v50  ;;  %v1400_v60 = vadd.f32 %v1399_v53, %v2766_v50 }
 0x429   : > { %v1438_v63 = vadd.f32 %v1437_v45, %v1423_v46 }
 0x42e   : > { %v2768_v51 = vpop.f32.mrf.mxu0 }
 0x42f   : > { %v1424_v61 = vmul.f32 %v2768_v51, %v2768_v51  ;;  %v1401_v12 = vadd.f32 %v1400_v60, %v2768_v51 }
 0x431   : > { %v1439_v17 = vadd.f32 %v1438_v63, %v1424_v61  ;;  %v2273_v61 = vld [vmem:[%s2523_s18 + $0x70] sm:$0xff] }
 0x432   : > { %1620 = vmatpush.bf16.msrb.mxu1 %v2273_v61 }
 0x436   : > { %v2770_v52 = vpop.f32.mrf.mxu0 }
 0x437   : > { %v1425_v15 = vmul.f32 %v2770_v52, %v2770_v52  ;;  %v1402_v19 = vadd.f32 %v1401_v12, %v2770_v52 }
 0x439   : > { %v1440_v42 = vadd.f32 %v1439_v17, %v1425_v15 }
 0x43e   : > { %v2772_v54 = vpop.f32.mrf.mxu0 }
 0x43f   : > { %v1426_v20 = vmul.f32 %v2772_v54, %v2772_v54  ;;  %v1403_v22 = vadd.f32 %v1402_v19, %v2772_v54  ;;  %v2272_v19 = vld [vmem:[%s2523_s18 + $0x68] sm:$0xff] }
 0x440   : > { %1621 = vmatpush.bf16.msrb.mxu1 %v2272_v19 }
 0x441   : > { %v1441_v21 = vadd.f32 %v1440_v42, %v1426_v20 }
 0x446   : > { %v2774_v55 = vpop.f32.mrf.mxu0 }
 0x447   : > { %v1427_v23 = vmul.f32 %v2774_v55, %v2774_v55  ;;  %v1404_v7 = vadd.f32 %v1403_v22, %v2774_v55 }
 0x449   : > { %v1442_v44 = vadd.f32 %v1441_v21, %v1427_v23  ;;  %v2271_v21 = vld [vmem:[%s2523_s18 + $0x60] sm:$0xff] }
 0x44a   : > { %1622 = vmatpush.bf16.msrb.mxu1 %v2271_v21 }
 0x44e   : > { %v2776_v56 = vpop.f32.mrf.mxu0 }
 0x44f   : > { %v1428_v24 = vmul.f32 %v2776_v56, %v2776_v56  ;;  %v1405_v11 = vadd.f32 %v1404_v7, %v2776_v56 }
 0x451   : > { %v1443_v26 = vadd.f32 %v1442_v44, %v1428_v24  ;;  %v2270_v24 = vld [vmem:[%s2523_s18 + $0x58] sm:$0xff] }
 0x452   : > { %1623 = vmatpush.bf16.msrb.mxu1 %v2270_v24 }
 0x456   : > { %v2778_v57 = vpop.f32.mrf.mxu0 }
 0x457   : > { %v1429_v10 = vmul.f32 %v2778_v57, %v2778_v57  ;;  %v1406_v32 = vadd.f32 %v1405_v11, %v2778_v57 }
 0x459   : > { %v1444_v25 = vadd.f32 %v1443_v26, %v1429_v10  ;;  %v2269_v10 = vld [vmem:[%s2523_s18 + $0x50] sm:$0xff]  ;;  %v2268_v26 = vld [vmem:[%s2523_s18 + $0x48] sm:$0xff] }
 0x45a   : > { %1624 = vmatpush.bf16.msrb.mxu1 %v2269_v10 }
 0x45e   : > { %v2780_v8 = vpop.f32.mrf.mxu0  ;;  %1625 = vmatpush.bf16.msrb.mxu1 %v2268_v26 }
 0x45f   : > { %v1430_v35 = vmul.f32 %v2780_v8, %v2780_v8  ;;  %v1407_v9 = vadd.f32 %v1406_v32, %v2780_v8 }
 0x461   : > { %v1445_v28 = vadd.f32 %v1444_v25, %v1430_v35  ;;  %v2267_v35 = vld [vmem:[%s2523_s18 + $0x40] sm:$0xff]  ;;  %s2994_s18 = scalar_lea.vmem %s3030_s8, %s2376_s11 }
 0x462   : > { %1626 = vmatpush.bf16.msrb.mxu1 %v2267_v35 }
 0x466   : > { %v2782_v48 = vpop.f32.mrf.mxu0 }
 0x467   : > { %v1431_v27 = vmul.f32 %v2782_v48, %v2782_v48  ;;  %v1408_v30 = vadd.f32 %v1407_v9, %v2782_v48 }
 0x469   : > { %v1446_v14 = vadd.f32 %v1445_v28, %v1431_v27 }
 0x46e   : > { %v2784_v58 = vpop.f32.mrf.mxu0 }
 0x46f   : > { %v1432_v2 = vmul.f32 %v2784_v58, %v2784_v58  ;;  %v1409_v31 = vadd.f32 %v1408_v30, %v2784_v58  ;;  %v2177_v30 = vld [vmem:[%s2563_s22 + $0x1] sm:$0x1] }
 0x471   : > { %v1447_v33 = vadd.f32 %v1446_v14, %v1432_v2 }
 0x476   : > { %v2797_v62 = vpop.f32.mrf.mxu0 }
 0x477   : > { %v1433_v16 = vmul.f32 %v2797_v62, %v2797_v62  ;;  %v1410_v1 = vadd.f32 %v1409_v31, %v2797_v62 }
 0x479   : > { %v1448_v34 = vadd.f32 %v1447_v33, %v1433_v16  ;;  %v2178_v16 = vld [vmem:[%s2570_s10 + $0x1] sm:$0x1] }
 0x47e   : > { %v2811_v13 = vpop.f32.mrf.mxu0 }
 0x47f   : > { %v1434_v4 = vmul.f32 %v2811_v13, %v2811_v13  ;;  %v1411_v37 = vadd.f32 %v1410_v1, %v2811_v13 }
 0x481   : > { %v1449_v36 = vadd.f32 %v1448_v34, %v1434_v4 }
 0x486   : > { %v2825_v43 = vpop.f32.mrf.mxu0 }
 0x487   : > { %v1435_v18 = vmul.f32 %v2825_v43, %v2825_v43  ;;  %v1412_v38 = vadd.f32 %v1411_v37, %v2825_v43 }
 0x489   : > { %v1450_v40 = vadd.f32 %v1449_v36, %v1435_v18 }
 0x48e   : > { %v1392_v6 = vpop.f32.mrf.mxu0 }
 0x48f   : > { %v1413_v3 = vadd.f32 %v1412_v38, %v1392_v6  ;;  %v1436_v41 = vmul.f32 %v1392_v6, %v1392_v6 }
 0x491   : > { %v1414_v47 = vrot.slane %v1413_v3, 4  ;;  %v1451_v5 = vadd.f32 %v1450_v40, %v1436_v41 }
 0x493   : > { %v1415_v39 = vadd.f32 %v1414_v47, %v1413_v3  ;;  %v1452_v0 = vrot.slane %v1451_v5, 4 }
 0x495   : > { %v1416_v53 = vrot.slane %v1415_v39, 2  ;;  %v1453_v46 = vadd.f32 %v1452_v0, %v1451_v5 }
 0x497   : > { %v1417_v45 = vadd.f32 %v1416_v53, %v1415_v39  ;;  %v1454_v60 = vrot.slane %v1453_v46, 2 }
 0x499   : > { %v1418_v63 = vrot.slane %v1417_v45, 1  ;;  %v1455_v12 = vadd.f32 %v1454_v60, %v1453_v46 }
 0x49b   : > { %v1419_v15 = vadd.f32 %v1418_v63, %v1417_v45  ;;  %v1456_v17 = vrot.slane %v1455_v12, 1 }
 0x49d   : > { %v1420_v20 = vmul.f32 0.0625, %v1419_v15  ;;  %v1457_v42 = vadd.f32 %v1456_v17, %v1455_v12 }
 0x49f   : > { %v1458_v22 = vmul.f32 0.0625, %v1457_v42  ;;  %v1459_v23 = vmul.f32 %v1420_v20, %v1420_v20 }
 0x4a1   : > { %v1460_v7 = vsub.f32 %v1458_v22, %v1459_v23 }
 0x4a3   : > { %v1461_v44 = vmax.f32 %v1460_v7, 0.0 }
 0x4a5   : > { %v1462_v11 = vadd.f32 1e-05, %v1461_v44 }
 0x4a7   : > { %2303 = vrsqrt.f32 %v1462_v11  ;;  %vm1469_vm7 = vweird.f32 %v1462_v11 }
 0x4ad   : > { %v2304_v32 = vpop.eup %2303 }
 0x4ae   : > { %v1464_v25 = vmul.f32 %v2304_v32, %v1462_v11  ;;  %vm1470_vm6 = vweird.f32 %v2304_v32 }
 0x4af   : > { %vm1471_vm8 = vmor %vm1469_vm7, %vm1470_vm6 }
 0x4b0   : > { %v1465_v9 = vmul.f32 %v2304_v32, %v1464_v25 }
 0x4b2   : > { %v1466_v27 = vmul.f32 0.5, %v1465_v9 }
 0x4b4   : > { %v1467_v28 = vsub.f32 1.5, %v1466_v27 }
 0x4b6   : > { %v1468_v2 = vmul.f32 %v2304_v32, %v1467_v28 }
 0x4b8   : > { %v1472_v14 = vsel %vm1471_vm8, %v2304_v32, %v1468_v2 }
 0x4b9   : > { %v1473_v31 = vmul.f32 %v2177_v30, %v1472_v14 }
 0x4bb   : > { %v1474_v33 = vmul.f32 %v1473_v31, %v1420_v20  ;;  %v2847_v1 = vperm.slane %v1473_v31, 0 }
 0x4bd   : > { %v1475_v4 = vsub.f32 %v2178_v16, %v1474_v33  ;;  %v1494_v34 = vmul.f32 %v2847_v1, %v1392_v6  ;;  %v1479_v18 = vmul.f32 %v2847_v1, %v2762_v29  ;;  %v1480_v36 = vmul.f32 %v2847_v1, %v2764_v49 }
 0x4be   : > { %v1489_v6 = vmul.f32 %v2847_v1, %v2782_v48  ;;  %v1490_v39 = vmul.f32 %v2847_v1, %v2784_v58  ;;  %v1481_v29 = vmul.f32 %v2847_v1, %v2766_v50  ;;  %v1482_v49 = vmul.f32 %v2847_v1, %v2768_v51 }
 0x4bf   : > { %v2850_v37 = vperm.slane %v1475_v4, 0  ;;  %v1491_v53 = vmul.f32 %v2847_v1, %v2797_v62  ;;  %v1492_v48 = vmul.f32 %v2847_v1, %v2811_v13  ;;  %v1493_v61 = vmul.f32 %v2847_v1, %v2825_v43 }
 0x4c0   : > { %v1483_v32 = vmul.f32 %v2847_v1, %v2770_v52  ;;  %v1484_v35 = vmul.f32 %v2847_v1, %v2772_v54  ;;  %v1485_v31 = vmul.f32 %v2847_v1, %v2774_v55  ;;  %v1486_v16 = vmul.f32 %v2847_v1, %v2776_v56 }
 0x4c1   : > { %v1513_v38 = vadd.f32 %v2850_v37, %v1494_v34  ;;  %v1498_v40 = vadd.f32 %v2850_v37, %v1479_v18  ;;  %v1499_v3 = vadd.f32 %v2850_v37, %v1480_v36  ;;  %v1508_v0 = vadd.f32 %v2850_v37, %v1489_v6 }
 0x4c2   : > { %v1509_v59 = vadd.f32 %v2850_v37, %v1490_v39  ;;  %v1500_v46 = vadd.f32 %v2850_v37, %v1481_v29  ;;  %v1501_v58 = vadd.f32 %v2850_v37, %v1482_v49  ;;  %v1510_v50 = vadd.f32 %v2850_v37, %v1491_v53 }
 0x4c3   : > { %v1514_v41 = vmax.f32 %v1498_v40, 0.0  ;;  %v1515_v47 = vmax.f32 %v1499_v3, 0.0  ;;  %v1524_v45 = vmax.f32 %v1508_v0, 0.0  ;;  %v1511_v51 = vadd.f32 %v2850_v37, %v1492_v48 }
 0x4c4   : > { %v1525_v60 = vmax.f32 %v1509_v59, 0.0  ;;  %v1529_v12 = vmax.f32 %v1513_v38, 0.0  ;;  %v1526_v62 = vmax.f32 %v1510_v50, 0.0  ;;  %v1512_v13 = vadd.f32 %v2850_v37, %v1493_v61 }
 0x4c5   : > { %v1546_v5 = vpack.c.bf16 %v1515_v47, %v1514_v41  ;;  %v1540_v63 = vmul.f32 0.0, %v1524_v45  ;;  %v1527_v17 = vmax.f32 %v1511_v51, 0.0  ;;  %v1516_v19 = vmax.f32 %v1500_v46, 0.0 }
 0x4c6   : > { %v1541_v15 = vmul.f32 0.0, %v1525_v60  ;;  %v1517_v20 = vmax.f32 %v1501_v58, 0.0  ;;  %v1545_v42 = vmul.f32 0.0, %v1529_v12  ;;  %v1542_v23 = vmul.f32 0.0, %v1526_v62 }
 0x4c7   : > { %1627 = vmatmul.bf16.vlgmr.msrb.gmra.mxu1 %v1546_v5  ;;  %v1543_v21 = vmul.f32 0.0, %v1527_v17  ;;  %v1528_v7 = vmax.f32 %v1512_v13, 0.0  ;;  %v1532_v11 = vmul.f32 0.0, %v1516_v19  ;;  %v1502_v25 = vadd.f32 %v2850_v37, %v1483_v32 }
 0x4c8   : > { %v1551_v22 = vpack.c.bf16 %v1541_v15, %v1540_v63  ;;  %v1533_v10 = vmul.f32 0.0, %v1517_v20  ;;  %v1503_v9 = vadd.f32 %v2850_v37, %v1484_v35  ;;  %v1504_v52 = vadd.f32 %v2850_v37, %v1485_v31 }
 0x4c9   : > { %v1552_v24 = vpack.c.bf16 %v1543_v21, %v1542_v23  ;;  %v1544_v44 = vmul.f32 0.0, %v1528_v7  ;;  %v1518_v27 = vmax.f32 %v1502_v25, 0.0  ;;  %v1505_v54 = vadd.f32 %v2850_v37, %v1486_v16 }
 0x4ca   : > { %v1547_v43 = vpack.c.bf16 %v1533_v10, %v1532_v11  ;;  %v1519_v28 = vmax.f32 %v1503_v9, 0.0  ;;  %v1520_v33 = vmax.f32 %v1504_v52, 0.0  ;;  %v1487_v38 = vmul.f32 %v2847_v1, %v2778_v57 }
 0x4cb   : > { %v1553_v26 = vpack.c.bf16 %v1545_v42, %v1544_v44  ;;  %v1534_v30 = vmul.f32 0.0, %v1518_v27  ;;  %v1521_v4 = vmax.f32 %v1505_v54, 0.0  ;;  %v1488_v40 = vmul.f32 %v2847_v1, %v2780_v8 }
 0x4cc   : > { %v1535_v2 = vmul.f32 0.0, %v1519_v28  ;;  %v1536_v34 = vmul.f32 0.0, %v1520_v33  ;;  %v1506_v55 = vadd.f32 %v2850_v37, %v1487_v38 }
 0x4cd   : > { %v1537_v18 = vmul.f32 0.0, %v1521_v4  ;;  %v1507_v56 = vadd.f32 %v2850_v37, %v1488_v40 }
 0x4ce   : > { %v1548_v14 = vpack.c.bf16 %v1535_v2, %v1534_v30  ;;  %v1522_v3 = vmax.f32 %v1506_v55, 0.0 }
 0x4cf   : > { %v1549_v36 = vpack.c.bf16 %v1537_v18, %v1536_v34  ;;  %v1523_v41 = vmax.f32 %v1507_v56, 0.0 }
 0x4d0   : > { %v1538_v47 = vmul.f32 0.0, %v1522_v3 }
 0x4d1   : > { %v1539_v5 = vmul.f32 0.0, %v1523_v41 }
 0x4d3   : > { %v1550_v6 = vpack.c.bf16 %v1539_v5, %v1538_v47 }
 0x4d7   : > { %1632 = vmatmul.bf16.gmra.mxu1 %v1547_v43 }
 0x4e7   : > { %1637 = vmatmul.bf16.gmra.mxu1 %v1548_v14 }
 0x4f7   : > { %1642 = vmatmul.bf16.gmra.mxu1 %v1549_v36 }
 0x507   : > { %1647 = vmatmul.bf16.gmra.mxu1 %v1550_v6 }
 0x517   : > { %1652 = vmatmul.bf16.gmra.mxu1 %v1551_v22 }
 0x527   : > { %1657 = vmatmul.bf16.gmra.mxu1 %v1552_v24 }
 0x537   : > { %1662 = vmatmul.bf16.gmra.mxu1 %v1553_v26 }
 0x544   : > { %v2898_v39 = vpop.f32.mrf.mxu1 }
 0x545   : > { %v1694_v45 = vmul.f32 %v2898_v39, %v2898_v39 }
 0x54c   : > { %v2900_v29 = vpop.f32.mrf.mxu1 }
 0x54d   : > { %v1695_v58 = vmul.f32 %v2900_v29, %v2900_v29  ;;  %v1672_v60 = vadd.f32 %v2900_v29, %v2898_v39 }
 0x54f   : > { %v1710_v51 = vadd.f32 %v1695_v58, %v1694_v45 }
 0x554   : > { %v2902_v57 = vpop.f32.mrf.mxu1 }
 0x555   : > { %v1696_v50 = vmul.f32 %v2902_v57, %v2902_v57  ;;  %v1673_v61 = vadd.f32 %v1672_v60, %v2902_v57 }
 0x557   : > { %v1711_v15 = vadd.f32 %v1710_v51, %v1696_v50 }
 0x55c   : > { %v2904_v8 = vpop.f32.mrf.mxu1 }
 0x55d   : > { %v1697_v63 = vmul.f32 %v2904_v8, %v2904_v8  ;;  %v1674_v62 = vadd.f32 %v1673_v61, %v2904_v8 }
 0x55f   : > { %v1712_v13 = vadd.f32 %v1711_v15, %v1697_v63 }
 0x564   : > { %v2906_v1 = vpop.f32.mrf.mxu1 }
 0x565   : > { %v1698_v17 = vmul.f32 %v2906_v1, %v2906_v1  ;;  %v1675_v19 = vadd.f32 %v1674_v62, %v2906_v1 }
 0x567   : > { %v1713_v42 = vadd.f32 %v1712_v13, %v1698_v17 }
 0x56c   : > { %v2908_v37 = vpop.f32.mrf.mxu1 }
 0x56d   : > { %v1699_v20 = vmul.f32 %v2908_v37, %v2908_v37  ;;  %v1676_v22 = vadd.f32 %v1675_v19, %v2908_v37 }
 0x56f   : > { %v1714_v21 = vadd.f32 %v1713_v42, %v1699_v20 }
 0x574   : > { %v2910_v49 = vpop.f32.mrf.mxu1 }
 0x575   : > { %v1700_v23 = vmul.f32 %v2910_v49, %v2910_v49  ;;  %v1677_v7 = vadd.f32 %v1676_v22, %v2910_v49 }
 0x577   : > { %v1715_v11 = vadd.f32 %v1714_v21, %v1700_v23 }
 0x57c   : > { %v2912_v0 = vpop.f32.mrf.mxu1 }
 0x57d   : > { %v1701_v24 = vmul.f32 %v2912_v0, %v2912_v0  ;;  %v1678_v10 = vadd.f32 %v1677_v7, %v2912_v0 }
 0x57f   : > { %v1716_v43 = vadd.f32 %v1715_v11, %v1701_v24 }
 0x584   : > { %v2914_v59 = vpop.f32.mrf.mxu1 }
 0x585   : > { %v1702_v26 = vmul.f32 %v2914_v59, %v2914_v59  ;;  %v1679_v32 = vadd.f32 %v1678_v10, %v2914_v59 }
 0x587   : > { %v1717_v25 = vadd.f32 %v1716_v43, %v1702_v26  ;;  %v2227_v26 = vld [vmem:[%s2699_s28 + $0x1] sm:$0x1] }
 0x58c   : > { %v2916_v53 = vpop.f32.mrf.mxu1 }
 0x58d   : > { %v1703_v35 = vmul.f32 %v2916_v53, %v2916_v53  ;;  %v1680_v9 = vadd.f32 %v1679_v32, %v2916_v53 }
 0x58f   : > { %v1718_v28 = vadd.f32 %v1717_v25, %v1703_v35  ;;  %v2228_v25 = vld [vmem:[%s2706_s13 + $0x1] sm:$0x1] }
 0x594   : > { %v2918_v48 = vpop.f32.mrf.mxu1 }
 0x595   : > { %v1704_v27 = vmul.f32 %v2918_v48, %v2918_v48  ;;  %v1681_v30 = vadd.f32 %v1680_v9, %v2918_v48 }
 0x597   : > { %v1719_v31 = vadd.f32 %v1718_v28, %v1704_v27 }
 0x59c   : > { %v2920_v46 = vpop.f32.mrf.mxu1 }
 0x59d   : > { %v1705_v2 = vmul.f32 %v2920_v46, %v2920_v46  ;;  %v1682_v16 = vadd.f32 %v1681_v30, %v2920_v46 }
 0x59f   : > { %v1720_v54 = vadd.f32 %v1719_v31, %v1705_v2 }
 0x5a4   : > { %v2933_v12 = vpop.f32.mrf.mxu1 }
 0x5a5   : > { %v1706_v52 = vmul.f32 %v2933_v12, %v2933_v12  ;;  %v1683_v33 = vadd.f32 %v1682_v16, %v2933_v12 }
 0x5a7   : > { %v1721_v34 = vadd.f32 %v1720_v54, %v1706_v52 }
 0x5ac   : > { %v2947_v44 = vpop.f32.mrf.mxu1 }
 0x5ad   : > { %v1707_v4 = vmul.f32 %v2947_v44, %v2947_v44  ;;  %v1684_v18 = vadd.f32 %v1683_v33, %v2947_v44 }
 0x5af   : > { %v1722_v38 = vadd.f32 %v1721_v34, %v1707_v4 }
 0x5b4   : > { %v2961_v14 = vpop.f32.mrf.mxu1 }
 0x5b5   : > { %v1708_v36 = vmul.f32 %v2961_v14, %v2961_v14  ;;  %v1685_v40 = vadd.f32 %v1684_v18, %v2961_v14 }
 0x5b7   : > { %v1723_v56 = vadd.f32 %v1722_v38, %v1708_v36 }
 0x5bc   : > { %v2973_v55 = vpop.f32.mrf.mxu1 }
 0x5bd   : > { %v1686_v3 = vadd.f32 %v1685_v40, %v2973_v55  ;;  %v1709_v41 = vmul.f32 %v2973_v55, %v2973_v55 }
 0x5bf   : > { %v1687_v47 = vrot.slane %v1686_v3, 4  ;;  %v1724_v5 = vadd.f32 %v1723_v56, %v1709_v41 }
 0x5c1   : > { %v1688_v6 = vadd.f32 %v1687_v47, %v1686_v3  ;;  %v1725_v58 = vrot.slane %v1724_v5, 4 }
 0x5c3   : > { %v1689_v45 = vrot.slane %v1688_v6, 2  ;;  %v1726_v60 = vadd.f32 %v1725_v58, %v1724_v5 }
 0x5c5   : > { %v1690_v50 = vadd.f32 %v1689_v45, %v1688_v6  ;;  %v1727_v51 = vrot.slane %v1726_v60, 2 }
 0x5c7   : > { %v1691_v61 = vrot.slane %v1690_v50, 1  ;;  %v1728_v63 = vadd.f32 %v1727_v51, %v1726_v60 }
 0x5c9   : > { %v1692_v15 = vadd.f32 %v1691_v61, %v1690_v50  ;;  %v1729_v62 = vrot.slane %v1728_v63, 1 }
 0x5cb   : > { %v1693_v17 = vmul.f32 0.0625, %v1692_v15  ;;  %v1730_v13 = vadd.f32 %v1729_v62, %v1728_v63 }
 0x5cd   : > { %v1731_v19 = vmul.f32 0.0625, %v1730_v13  ;;  %v1732_v20 = vmul.f32 %v1693_v17, %v1693_v17 }
 0x5cf   : > { %v1733_v42 = vsub.f32 %v1731_v19, %v1732_v20 }
 0x5d1   : > { %v1734_v22 = vmax.f32 %v1733_v42, 0.0 }
 0x5d3   : > { %v1735_v23 = vadd.f32 1e-05, %v1734_v22 }
 0x5d5   : > { %2305 = vrsqrt.f32 %v1735_v23  ;;  %vm1742_vm10 = vweird.f32 %v1735_v23 }
 0x5db   : > { %v2306_v21 = vpop.eup %2305 }
 0x5dc   : > { %v1737_v7 = vmul.f32 %v2306_v21, %v1735_v23  ;;  %vm1743_vm9 = vweird.f32 %v2306_v21 }
 0x5dd   : > { %vm1744_vm11 = vmor %vm1742_vm10, %vm1743_vm9 }
 0x5de   : > { %v1738_v24 = vmul.f32 %v2306_v21, %v1737_v7 }
 0x5e0   : > { %v1739_v11 = vmul.f32 0.5, %v1738_v24 }
 0x5e2   : > { %v1740_v10 = vsub.f32 1.5, %v1739_v11 }
 0x5e4   : > { %v1741_v43 = vmul.f32 %v2306_v21, %v1740_v10 }
 0x5e6   : > { %v1745_v32 = vsel %vm1744_vm11, %v2306_v21, %v1741_v43 }
 0x5e7   : > { %v1746_v35 = vmul.f32 %v2227_v26, %v1745_v32 }
 0x5e9   : > { %v1747_v9 = vmul.f32 %v1746_v35, %v1693_v17  ;;  %v1750_v27 = vperm.slane %v1746_v35, 0 }
 0x5eb   : > { %v1748_v28 = vsub.f32 %v2228_v25, %v1747_v9  ;;  %v1752_v30 = vmul.f32 %v1750_v27, %v2898_v39  ;;  %v1753_v2 = vmul.f32 %v1750_v27, %v2900_v29  ;;  %v1754_v31 = vmul.f32 %v1750_v27, %v2902_v57 }
 0x5ec   : > { %v1755_v16 = vmul.f32 %v1750_v27, %v2904_v8  ;;  %v1756_v54 = vmul.f32 %v1750_v27, %v2906_v1  ;;  %v1757_v33 = vmul.f32 %v1750_v27, %v2908_v37  ;;  %v1758_v4 = vmul.f32 %v1750_v27, %v2910_v49 }
 0x5ed   : > { %v1769_v52 = vperm.slane %v1748_v28, 0  ;;  %v1759_v39 = vmul.f32 %v1750_v27, %v2912_v0  ;;  %v1760_v29 = vmul.f32 %v1750_v27, %v2914_v59  ;;  %v1761_v56 = vmul.f32 %v1750_v27, %v2916_v53 }
 0x5ee   : > { %v1762_v1 = vmul.f32 %v1750_v27, %v2918_v48  ;;  %v1763_v37 = vmul.f32 %v1750_v27, %v2920_v46  ;;  %v1764_v53 = vmul.f32 %v1750_v27, %v2933_v12  ;;  %v1765_v45 = vmul.f32 %v1750_v27, %v2947_v44 }
 0x5ef   : > { %v1771_v34 = vadd.f32 %v1769_v52, %v1752_v30  ;;  %v1772_v18 = vadd.f32 %v1769_v52, %v1753_v2  ;;  %v1773_v36 = vadd.f32 %v1769_v52, %v1754_v31  ;;  %v1774_v38 = vadd.f32 %v1769_v52, %v1755_v16 }
 0x5f0   : > { %v1775_v40 = vadd.f32 %v1769_v52, %v1756_v54  ;;  %v1776_v57 = vadd.f32 %v1769_v52, %v1757_v33  ;;  %v1777_v8 = vadd.f32 %v1769_v52, %v1758_v4  ;;  %v1778_v49 = vadd.f32 %v1769_v52, %v1759_v39 }
 0x5f1   : > { %v1779_v3 = vadd.f32 %v1769_v52, %v1760_v29  ;;  %v1787_v0 = vmax.f32 %v1771_v34, 0.0  ;;  %v1788_v59 = vmax.f32 %v1772_v18, 0.0  ;;  %v1789_v41 = vmax.f32 %v1773_v36, 0.0 }
 0x5f2   : > { %v1790_v47 = vmax.f32 %v1774_v38, 0.0  ;;  %v1780_v5 = vadd.f32 %v1769_v52, %v1761_v56  ;;  %v1791_v6 = vmax.f32 %v1775_v40, 0.0  ;;  %v1792_v58 = vmax.f32 %v1776_v57, 0.0 }
 0x5f3   : > { %v1781_v60 = vadd.f32 %v1769_v52, %v1762_v1  ;;  %v1793_v50 = vmax.f32 %v1777_v8, 0.0  ;;  %1841 = vst [vmem:[%s2994_s18] sm:$0xff] %v1787_v0  ;;  %v1766_v48 = vmul.f32 %v1750_v27, %v2961_v14  ;;  %v1782_v46 = vadd.f32 %v1769_v52, %v1763_v37 }
 0x5f4   : > { %v1783_v51 = vadd.f32 %v1769_v52, %v1764_v53  ;;  %v1794_v61 = vmax.f32 %v1778_v49, 0.0  ;;  %1842 = vst [vmem:[%s2994_s18 + $0x8] sm:$0xff] %v1788_v59  ;;  %v1795_v63 = vmax.f32 %v1779_v3, 0.0  ;;  %v1805_v15 = vmul.f32 0.0, %v1789_v41 }
 0x5f5   : > { %v1806_v62 = vmul.f32 0.0, %v1790_v47  ;;  %v1807_v12 = vmul.f32 0.0, %v1791_v6  ;;  %v1767_v17 = vmul.f32 %v1750_v27, %v2973_v55  ;;  %v1784_v13 = vadd.f32 %v1769_v52, %v1765_v45 }
 0x5f6   : > { %v1796_v44 = vmax.f32 %v1780_v5, 0.0  ;;  %v1808_v19 = vmul.f32 0.0, %v1792_v58  ;;  %v1785_v20 = vadd.f32 %v1769_v52, %v1766_v48  ;;  %v1797_v42 = vmax.f32 %v1781_v60, 0.0  ;;  %1843 = vst [vmem:[%s2994_s18 + $0x10] sm:$0xff] %v1805_v15 }
 0x5f7   : > { %v1809_v14 = vmul.f32 0.0, %v1793_v50  ;;  %v1786_v22 = vadd.f32 %v1769_v52, %v1767_v17  ;;  %v1798_v23 = vmax.f32 %v1782_v46, 0.0  ;;  %v1810_v21 = vmul.f32 0.0, %v1794_v61  ;;  %1844 = vst [vmem:[%s2994_s18 + $0x18] sm:$0xff] %v1806_v62 }
 0x5f8   : > { %v1819_v7 = vadd.f32 %v1788_v59, %v1787_v0  ;;  %v1799_v24 = vmax.f32 %v1783_v51, 0.0  ;;  %v1811_v11 = vmul.f32 0.0, %v1795_v63  ;;  %1845 = vst [vmem:[%s2994_s18 + $0x20] sm:$0xff] %v1807_v12  ;;  %v1800_v55 = vmax.f32 %v1784_v13, 0.0 }
 0x5f9   : > { %v1812_v10 = vmul.f32 0.0, %v1796_v44  ;;  %1846 = vst [vmem:[%s2994_s18 + $0x28] sm:$0xff] %v1808_v19  ;;  %v1801_v43 = vmax.f32 %v1785_v20, 0.0  ;;  %v1813_v32 = vmul.f32 0.0, %v1797_v42  ;;  %v1802_v35 = vmax.f32 %v1786_v22, 0.0 }
 0x5fa   : > { %v1820_v26 = vadd.f32 %v1819_v7, %v1805_v15  ;;  %1847 = vst [vmem:[%s2994_s18 + $0x30] sm:$0xff] %v1809_v14  ;;  %v1814_v25 = vmul.f32 0.0, %v1798_v23  ;;  %v1815_v27 = vmul.f32 0.0, %v1799_v24  ;;  %v1816_v28 = vmul.f32 0.0, %v1800_v55 }
 0x5fb   : > { %1848 = vst [vmem:[%s2994_s18 + $0x38] sm:$0xff] %v1810_v21  ;;  %v1817_v2 = vmul.f32 0.0, %v1801_v43  ;;  %v1818_v31 = vmul.f32 0.0, %v1802_v35 }
 0x5fc   : > { %v1821_v9 = vadd.f32 %v1820_v26, %v1806_v62  ;;  %1849 = vst [vmem:[%s2994_s18 + $0x40] sm:$0xff] %v1811_v11 }
 0x5fd   : > { %1850 = vst [vmem:[%s2994_s18 + $0x48] sm:$0xff] %v1812_v10 }
 0x5fe   : > { %v1822_v30 = vadd.f32 %v1821_v9, %v1807_v12  ;;  %1851 = vst [vmem:[%s2994_s18 + $0x50] sm:$0xff] %v1813_v32 }
 0x5ff   : > { %1852 = vst [vmem:[%s2994_s18 + $0x58] sm:$0xff] %v1814_v25 }
 0x600   : > { %v1823_v16 = vadd.f32 %v1822_v30, %v1808_v19  ;;  %1853 = vst [vmem:[%s2994_s18 + $0x60] sm:$0xff] %v1815_v27 }
 0x601   : > { %1854 = vst [vmem:[%s2994_s18 + $0x68] sm:$0xff] %v1816_v28 }
 0x602   : > { %v1824_v52 = vadd.f32 %v1823_v16, %v1809_v14  ;;  %1855 = vst [vmem:[%s2994_s18 + $0x70] sm:$0xff] %v1817_v2 }
 0x603   : > { %1856 = vst [vmem:[%s2994_s18 + $0x78] sm:$0xff] %v1818_v31 }
 0x604   : > { %v1825_v54 = vadd.f32 %v1824_v52, %v1810_v21 }
 0x606   : > { %v1826_v33 = vadd.f32 %v1825_v54, %v1811_v11 }
 0x608   : > { %v1827_v4 = vadd.f32 %v1826_v33, %v1812_v10 }
 0x60a   : > { %v1828_v34 = vadd.f32 %v1827_v4, %v1813_v32 }
 0x60c   : > { %v1829_v18 = vadd.f32 %v1828_v34, %v1814_v25 }
 0x60e   : > { %v1830_v36 = vadd.f32 %v1829_v18, %v1815_v27 }
 0x610   : > { %v1831_v38 = vadd.f32 %v1830_v36, %v1816_v28 }
 0x612   : > { %v1832_v39 = vadd.f32 %v1831_v38, %v1817_v2 }
 0x614   : > { %v1833_v29 = vadd.f32 %v1832_v39, %v1818_v31 }
 0x616   : > { %v1834_v40 = vrot.slane %v1833_v29, 4 }
 0x618   : > { %v1835_v57 = vadd.f32 %v1834_v40, %v1833_v29 }
 0x61a   : > { %v1836_v56 = vrot.slane %v1835_v57, 2 }
 0x61c   : > { %v1837_v8 = vadd.f32 %v1836_v56, %v1835_v57 }
 0x61e   : > { %v1838_v1 = vrot.slane %v1837_v8, 1 }
 0x620   : > { %v1839_v37 = vadd.f32 %v1838_v1, %v1837_v8 }
 0x622   : > { %1840 = vst [vmem:[%s2744_s16 + $0x1] sm:$0x1] %v1839_v37 }
 0x623 PF: > { %s20_s30 = sadd.s32 1, %s2313_s30  }
 0x624   : > { %p17_p4 = scmp.ge.s32.totalorder %s20_s30, 4  }
 0x626   :  { %19 = sbr.rel (!%p17_p4) target bundleno = 1 (0x1), region = 118 }

</bundles_post_ra>
